<compile_context>
chip_gen: v7x
topology: tpu7x:2x2x1
jax: 0.10.0
libtpu: 0.0.40
codegen_flags: <defaults>
</compile_context>

<pallas_src>
import math
import functools

import jax
import jax.numpy as jnp
from jax import lax
from jax.experimental import pallas as pl
from jax.experimental.pallas import tpu as pltpu

LN_EPS = 1e-5   # torch.nn.LayerNorm default
DH = 32         # true dim_head (PerAttention heads=1, dim_head=32)
DHP = 128       # zero-padded dim_head (lane-dense); padding is exact


# ----------------------------- math helpers (in- and out-of-kernel) -----------------------------

def _layernorm(x, g, b):
    mu = jnp.mean(x, axis=-1, keepdims=True)
    var = jnp.mean((x - mu) ** 2, axis=-1, keepdims=True)
    return (x - mu) * lax.rsqrt(var + LN_EPS) * g + b


def _mish(x):
    # x * tanh(softplus(x)); numerically stable softplus
    sp = jnp.log(1.0 + jnp.exp(-jnp.abs(x))) + jnp.maximum(x, 0.0)
    return x * jnp.tanh(sp)


def _gelu_tanh(x):
    # TODO(synk): tanh-approx GELU (torch F.gelu defaults to erf; ~1e-3 deviation)
    c = math.sqrt(2.0 / math.pi)
    return 0.5 * x * (1.0 + jnp.tanh(c * (x + 0.044715 * x * x * x)))


def _attn_core(qn, cn, wqkv, wo, bo, scale, is_self):
    # single-head Perceiver attention (eval mode -> dropout no-op).
    # wqkv = [wq | wk | wv], each zero-padded to DHP lanes; wo zero-padded rows. Exact.
    qb = qn.astype(jnp.bfloat16)
    if is_self:
        h = jnp.dot(qb, wqkv, preferred_element_type=jnp.float32)        # one MXU push
        q, k, v = h[:, :DHP], h[:, DHP:2 * DHP], h[:, 2 * DHP:]
    else:
        cb = cn.astype(jnp.bfloat16)
        q = jnp.dot(qb, wqkv[:, :DHP], preferred_element_type=jnp.float32)
        kv = jnp.dot(cb, wqkv[:, DHP:], preferred_element_type=jnp.float32)
        k, v = kv[:, :DHP], kv[:, DHP:]
    # q·kᵀ without an explicit transpose: contract dim 1 of both operands.
    sim = lax.dot_general(q.astype(jnp.bfloat16), k.astype(jnp.bfloat16),
                          (((1,), (1,)), ((), ())),
                          preferred_element_type=jnp.float32) * scale
    sim = sim - jnp.max(sim, axis=-1, keepdims=True)
    p = jnp.exp(sim)
    p = p * pl.reciprocal(jnp.sum(p, axis=-1, keepdims=True), approx=True)
    out = jnp.dot(p.astype(jnp.bfloat16), v.astype(jnp.bfloat16),
                  preferred_element_type=jnp.float32)
    return jnp.dot(out.astype(jnp.bfloat16), wo, preferred_element_type=jnp.float32) + bo


def _geglu_ff(x, lng, lnb, w1v, b1v, w1g, b1g, w2, b2):
    # PreNorm FeedForward: LN -> Linear(d, 2*d*mult) -> GEGLU -> Linear(d*mult, d)
    # w1 is pre-split into value/gate halves -> no (·, 2048) intermediate or slices.
    xn = _layernorm(x, lng, lnb)
    xb = xn.astype(jnp.bfloat16)
    hv = jnp.dot(xb, w1v, preferred_element_type=jnp.float32) + b1v
    hg = jnp.dot(xb, w1g, preferred_element_type=jnp.float32) + b1g
    h = hv * _gelu_tanh(hg)
    return jnp.dot(h.astype(jnp.bfloat16), w2, preferred_element_type=jnp.float32) + b2


# ----------------------------- Pallas kernel bodies -----------------------------

def _embed_tokens_kernel(obs_ref, traj_ref, lng_ref, lnb_ref, w1_ref, b1_ref,
                         w2_ref, b2_ref, wt_ref, bt_ref, obs_o_ref, traj_o_ref):
    # embed_history MLP (LN -> Linear -> Mish -> Linear) and embed_traj Linear, one launch.
    o = _layernorm(obs_ref[...].astype(jnp.float32), lng_ref[...], lnb_ref[...])
    h = jnp.dot(o.astype(jnp.bfloat16), w1_ref[...],
                preferred_element_type=jnp.float32) + b1_ref[...]
    h = _mish(h)
    obs_o_ref[...] = (jnp.dot(h.astype(jnp.bfloat16), w2_ref[...],
                              preferred_element_type=jnp.float32) + b2_ref[...]
                      ).astype(obs_o_ref.dtype)
    traj_o_ref[...] = (jnp.dot(traj_ref[...].astype(jnp.bfloat16), wt_ref[...],
                               preferred_element_type=jnp.float32) + bt_ref[...]
                       ).astype(traj_o_ref.dtype)


def _fused_transformer_kernel(*refs, n_layers, scale):
    # One grid step == one batch element. Everything from embed_ln to predict_traj.
    it = iter(refs)
    nx = lambda: next(it)
    sc_ref, prm_ref, t_ref, tre_ref, pos_ref, post_ref = nx(), nx(), nx(), nx(), nx(), nx()
    elng_ref, elnb_ref, lat_ref = nx(), nx(), nx()
    ca = [nx() for _ in range(7)]                                   # cross attention
    cf = [nx() for _ in range(8)]                                   # cross feed-forward
    layers = [([nx() for _ in range(5)], [nx() for _ in range(8)])  # self layers
              for _ in range(n_layers)]
    dec = [nx() for _ in range(7)]                                  # decoder cross attention
    wp_ref, bp_ref = nx(), nx()                                     # predict_traj
    pred_ref, tok_ref = nx(), nx()                                  # outputs

    f32 = jnp.float32
    prm = prm_ref[0].astype(f32)          # (1, D)
    t = t_ref[0].astype(f32)              # (1, D)
    elng, elnb = elng_ref[...], elnb_ref[...]

    # stacked = embed_ln( t * (prompt * stacked_cat) + position_emb[:, :S] )
    stacked = t * (prm * sc_ref[0].astype(f32)) + pos_ref[0].astype(f32)
    stacked = _layernorm(stacked, elng, elnb)                       # (S, D) context

    # decoder queries == last Lt rows of `stacked`; recompute them from traj_e
    # (identical values) instead of taking an unaligned sublane slice.
    dec_q = t * (prm * tre_ref[0].astype(f32)) + post_ref[0].astype(f32)
    dec_q = _layernorm(dec_q, elng, elnb)                           # (Lt, D)

    x = lat_ref[...].astype(f32)                                    # (num_latents, D)

    # cross-attention block + GEGLU FF, residuals in-kernel (iterations == 1)
    lnqg, lnqb, lncg, lncb, wqkv, wo, bo = [r[...] for r in ca]
    xn = _layernorm(x, lnqg, lnqb)
    cn = _layernorm(stacked, lncg, lncb)
    x = x + _attn_core(xn, cn, wqkv, wo, bo, scale, is_self=False)
    x = x + _geglu_ff(x, *[r[...] for r in cf])

    # self-attention layers
    for ap, fp in layers:
        lng, lnb, wqkv, wo, bo = [r[...] for r in ap]
        xn = _layernorm(x, lng, lnb)
        x = x + _attn_core(xn, xn, wqkv, wo, bo, scale, is_self=True)
        x = x + _geglu_ff(x, *[r[...] for r in fp])

    # decoder cross-attention (queries = kept rows only), no residual
    dlnqg, dlnqb, dlncg, dlncb, dwqkv, dwo, dbo = [r[...] for r in dec]
    qn = _layernorm(dec_q, dlnqg, dlnqb)
    cn = _layernorm(x, dlncg, dlncb)
    lat_out = _attn_core(qn, cn, dwqkv, dwo, dbo, scale, is_self=False)   # (Lt, D)
    tok_ref[0] = lat_out.astype(tok_ref.dtype)

    # predict_traj linear fused on the surviving rows
    pred = jnp.dot(lat_out.astype(jnp.bfloat16), wp_ref[...],
                   preferred_element_type=jnp.float32) + bp_ref[...]
    pred_ref[0] = pred.astype(pred_ref.dtype)


# ----------------------------- pallas_call wrappers -----------------------------

def pallas_embed_tokens(obs2d, traj2d, eh, et):
    m, din = obs2d.shape
    h = eh["w1"].shape[1]
    dout = eh["w2"].shape[1]
    full2 = lambda shape: pl.BlockSpec(shape, lambda i: (0, 0))
    return pl.pallas_call(
        _embed_tokens_kernel,
        out_shape=(jax.ShapeDtypeStruct((m, dout), jnp.float32),
                   jax.ShapeDtypeStruct((m, dout), jnp.float32)),
        grid=(1,),
        in_specs=[full2((m, din)), full2((m, din)),
                  full2((1, din)), full2((1, din)),
                  full2((din, h)), full2((1, h)),
                  full2((h, dout)), full2((1, dout)),
                  full2((din, dout)), full2((1, dout))],
        out_specs=(full2((m, dout)), full2((m, dout))),
        compiler_params=pltpu.CompilerParams(dimension_semantics=("arbitrary",)),
    )(obs2d, traj2d, eh["ln_g"].reshape(1, -1), eh["ln_b"].reshape(1, -1),
      eh["w1"], eh["b1"].reshape(1, -1), eh["w2"], eh["b2"].reshape(1, -1),
      et["w"], et["b"].reshape(1, -1))


def pallas_fused_transformer(stacked_cat, prompt, t, traj_e, pos, pos_traj, params):
    bsz, s, d = stacked_cat.shape
    lt = traj_e.shape[1]
    nl = params["latents"].shape[0]
    obs_cls = params["predict_traj"]["w"].shape[1]
    n_layers = len(params["layers"])

    def bspec(n, f):
        return pl.BlockSpec((1, n, f), lambda i: (i, 0, 0))

    def rep3(n, f):
        return pl.BlockSpec((1, n, f), lambda i: (0, 0, 0))

    def rep2(shape):
        return pl.BlockSpec(shape, lambda i: (0, 0))

    vec = lambda v: v.reshape(1, -1)

    specs = [bspec(s, d), bspec(1, d), bspec(1, d), bspec(lt, d),
             rep3(s, d), rep3(lt, d), rep2((1, d)), rep2((1, d)), rep2((nl, d))]
    args = [stacked_cat, prompt, t, traj_e, pos, pos_traj,
            vec(params["embed_ln"]["g"]), vec(params["embed_ln"]["b"]), params["latents"]]

    def add_attn(ap, cross):
        for name in (("lnq_g", "lnq_b", "lnc_g", "lnc_b") if cross else ("lnq_g", "lnq_b")):
            specs.append(rep2((1, d))); args.append(vec(ap[name]))
        specs.append(rep2(ap["wqkv"].shape)); args.append(ap["wqkv"])
        specs.append(rep2(ap["wo"].shape)); args.append(ap["wo"])
        specs.append(rep2((1, d))); args.append(vec(ap["bo"]))

    def add_ff(fp):
        specs.append(rep2((1, d))); args.append(vec(fp["ln_g"]))
        specs.append(rep2((1, d))); args.append(vec(fp["ln_b"]))
        for w, b in ((fp["w1v"], fp["b1v"]), (fp["w1g"], fp["b1g"]), (fp["w2"], fp["b2"])):
            specs.append(rep2(w.shape)); args.append(w)
            specs.append(rep2((1, b.shape[0]))); args.append(vec(b))

    add_attn(params["cross_attn"], cross=True)
    add_ff(params["cross_ff"])
    for ap, fp in params["layers"]:
        add_attn(ap, cross=False)
        add_ff(fp)
    add_attn(params["decoder_attn"], cross=True)
    specs.append(rep2(params["predict_traj"]["w"].shape)); args.append(params["predict_traj"]["w"])
    specs.append(rep2((1, obs_cls))); args.append(vec(params["predict_traj"]["b"]))

    kernel = functools.partial(_fused_transformer_kernel,
                               n_layers=n_layers, scale=float(DH) ** -0.5)
    return pl.pallas_call(
        kernel,
        out_shape=(jax.ShapeDtypeStruct((bsz, lt, obs_cls), jnp.float32),
                   jax.ShapeDtypeStruct((bsz, lt, d), jnp.float32)),
        grid=(bsz,),
        in_specs=specs,
        out_specs=(bspec(lt, obs_cls), bspec(lt, d)),
        compiler_params=pltpu.CompilerParams(
            dimension_semantics=("parallel",),
            vmem_limit_bytes=48 * 1024 * 1024),
    )(*args)


# ----------------------------- parameters & glue -----------------------------

def sinusoidal_pos_emb(t, dim):
    half = dim // 2
    freqs = jnp.exp(jnp.arange(half, dtype=jnp.float32) * (-math.log(10000.0) / (half - 1)))
    args = t.astype(jnp.float32)[:, None] * freqs[None, :]
    return jnp.concatenate([jnp.sin(args), jnp.cos(args)], axis=-1)


def _normal(key, shape, scale=0.02):
    return scale * jax.random.normal(key, shape, dtype=jnp.float32)


def init_params(key, *, dim, hidden, cond_feat, n_codes, num_latents,
                obs_cls, ff_mult, depth, pos_len):
    keys = iter(jax.random.split(key, 192))
    nk = lambda: next(keys)
    wdt = jnp.bfloat16   # matmul weights live in bf16; accumulation is f32 in-kernel

    def attn_p(cross):
        pad_cols = lambda w: jnp.pad(w, ((0, 0), (0, DHP - DH)))
        wqkv = jnp.concatenate([pad_cols(_normal(nk(), (hidden, DH))) for _ in range(3)],
                               axis=1).astype(wdt)                      # (hidden, 3*DHP)
        wo = jnp.pad(_normal(nk(), (DH, hidden)), ((0, DHP - DH), (0, 0))).astype(wdt)
        p = {"lnq_g": jnp.ones((hidden,), jnp.float32), "lnq_b": jnp.zeros((hidden,), jnp.float32),
             "wqkv": wqkv, "wo": wo, "bo": jnp.zeros((hidden,), jnp.float32)}
        if cross:
            p["lnc_g"] = jnp.ones((hidden,), jnp.float32)
            p["lnc_b"] = jnp.zeros((hidden,), jnp.float32)
        return p

    def ff_p():  # Linear(d, 2*d*mult) -> GEGLU -> Linear(d*mult, d), w1 pre-split
        h = hidden * ff_mult
        return {"ln_g": jnp.ones((hidden,), jnp.float32), "ln_b": jnp.zeros((hidden,), jnp.float32),
                "w1v": _normal(nk(), (hidden, h)).astype(wdt), "b1v": jnp.zeros((h,), jnp.float32),
                "w1g": _normal(nk(), (hidden, h)).astype(wdt), "b1g": jnp.zeros((h,), jnp.float32),
                "w2": _normal(nk(), (h, hidden)).astype(wdt), "b2": jnp.zeros((hidden,), jnp.float32)}

    return {
        "codebook": _normal(nk(), (n_codes, dim), scale=1.0),        # synthetic vqvae codebook
        # prompt_embed & time_mlp stay in plain JAX (2 rows) -> f32 weights
        "prompt_embed": {"ln_g": jnp.ones((cond_feat,), jnp.float32),
                         "ln_b": jnp.zeros((cond_feat,), jnp.float32),
                         "w1": _normal(nk(), (cond_feat, hidden)), "b1": jnp.zeros((hidden,), jnp.float32),
                         "w2": _normal(nk(), (hidden, hidden)), "b2": jnp.zeros((hidden,), jnp.float32)},
        "time_mlp": {"w1": _normal(nk(), (dim, dim * 4)), "b1": jnp.zeros((dim * 4,), jnp.float32),
                     "w2": _normal(nk(), (dim * 4, dim)), "b2": jnp.zeros((dim,), jnp.float32)},
        "embed_history": {"ln_g": jnp.ones((dim,), jnp.float32), "ln_b": jnp.zeros((dim,), jnp.float32),
                          "w1": _normal(nk(), (dim, 2 * hidden)).astype(wdt),
                          "b1": jnp.zeros((2 * hidden,), jnp.float32),
                          "w2": _normal(nk(), (2 * hidden, hidden)).astype(wdt),
                          "b2": jnp.zeros((hidden,), jnp.float32)},
        "embed_traj": {"w": _normal(nk(), (dim, hidden)).astype(wdt),
                       "b": jnp.zeros((hidden,), jnp.float32)},
        "embed_ln": {"g": jnp.ones((hidden,), jnp.float32), "b": jnp.zeros((hidden,), jnp.float32)},
        "position_emb": jnp.zeros((1, pos_len, hidden), jnp.float32),  # torch init is zeros
        "latents": _normal(nk(), (num_latents, hidden), scale=1.0),
        "cross_attn": attn_p(cross=True),
        "cross_ff": ff_p(),
        "layers": [(attn_p(cross=False), ff_p()) for _ in range(depth // 2)],
        "decoder_attn": attn_p(cross=True),
        "predict_traj": {"w": _normal(nk(), (hidden, obs_cls)).astype(wdt),
                         "b": jnp.zeros((obs_cls,), jnp.float32)},
    }


def pretrain_forward(params, traj_obs_idx, time, cond, x_condition_idx):
    # TODO(synk): vqvae codebook gather kept in plain JAX (data-dependent gather, not a hot path)
    cb = params["codebook"]
    bsz = traj_obs_idx.shape[0]
    dim = cb.shape[1]
    traj_tok = cb[traj_obs_idx].reshape(bsz, -1, dim)       # (B, Lt, D)
    obs_tok = cb[x_condition_idx].reshape(bsz, -1, dim)     # (B, Lo, D)
    lt, lo = traj_tok.shape[1], obs_tok.shape[1]

    # prompt_embed / time_mlp: only B(=2) rows -> plain JAX (launch + weight DMA would dominate)
    pe = params["prompt_embed"]
    p = _layernorm(cond.astype(jnp.float32), pe["ln_g"], pe["ln_b"])
    p = _mish(jnp.dot(p, pe["w1"]) + pe["b1"])
    prompt = (jnp.dot(p, pe["w2"]) + pe["b2"])[:, None, :]  # (B, 1, D)

    temb = sinusoidal_pos_emb(time, dim)
    tp = params["time_mlp"]
    t = (jnp.dot(_mish(jnp.dot(temb, tp["w1"]) + tp["b1"]), tp["w2"]) + tp["b2"])[:, None, :]

    # embed_history MLP + embed_traj Linear, one launch over B*L flattened rows
    obs_e, traj_e = pallas_embed_tokens(obs_tok.reshape(bsz * lo, dim),
                                        traj_tok.reshape(bsz * lt, dim),
                                        params["embed_history"], params["embed_traj"])
    obs_e = obs_e.reshape(bsz, lo, -1)
    traj_e = traj_e.reshape(bsz, lt, -1)

    stacked_cat = jnp.concatenate([t, prompt, obs_e, traj_e], axis=1)   # (B, S, D)
    s = stacked_cat.shape[1]
    pos = params["position_emb"][:, :s, :]
    pos_traj = params["position_emb"][:, s - lt:s, :]

    # everything else (embed_ln .. predict_traj) in ONE fused pallas_call
    predicted_traj, predicted_token_traj = pallas_fused_transformer(
        stacked_cat, prompt, t, traj_e, pos, pos_traj, params)
    return predicted_traj, predicted_token_traj


# ----------------------------- main -----------------------------

if __name__ == "__main__":
    B = 2
    DIM = 256            # dim == hidden_dim == hidden_size
    HIDDEN = 256
    COND_FEAT = 1024     # hardcoded LayerNorm(1024) / Linear(1024, hidden)
    N_CODES = 64         # synthetic vqvae codebook size
    NUM_LATENTS = 128
    OBS_CLS = 256
    FF_MULT = 4
    DEPTH = 2            # -> one self-attn + FF layer
    POS_LEN = 1 + 1 + 2 * 12 * 12 * 8 + 2 * 12 * 12 * 8   # as in the module

    root = jax.random.PRNGKey(0)
    kp, k1, k2, k3, k4 = jax.random.split(root, 5)
    params = init_params(kp, dim=DIM, hidden=HIDDEN, cond_feat=COND_FEAT,
                         n_codes=N_CODES, num_latents=NUM_LATENTS, obs_cls=OBS_CLS,
                         ff_mult=FF_MULT, depth=DEPTH, pos_len=POS_LEN)

    # inputs: integer VQ code indices (small video grid 2x4x4 = 32 tokens each)
    traj_obs = jax.random.randint(k1, (B, 2, 4, 4), 0, N_CODES, dtype=jnp.int32)
    x_condition = jax.random.randint(k2, (B, 2, 4, 4), 0, N_CODES, dtype=jnp.int32)
    cond = jax.random.normal(k3, (B, COND_FEAT), dtype=jnp.float32)
    time = jax.random.uniform(k4, (B,), dtype=jnp.float32, minval=0.0, maxval=100.0)

    predicted_traj, predicted_token_traj = pretrain_forward(
        params, traj_obs, time, cond, x_condition)
    jax.block_until_ready((predicted_traj, predicted_token_traj))

    assert predicted_traj.shape == (B, 32, OBS_CLS), predicted_traj.shape
    assert predicted_token_traj.shape == (B, 32, HIDDEN), predicted_token_traj.shape
    assert bool(jnp.all(jnp.isfinite(predicted_traj)))
    assert bool(jnp.all(jnp.isfinite(predicted_token_traj)))
    print("KERNEL_OK")
</pallas_src>

<mosaic_0001>
module attributes {stable_mosaic.version = 11 : i64} {
  func.func @_embed_tokens_kernel(%arg0: i32, %arg1: memref<64x256xf32, #tpu.memory_space<vmem>>, %arg2: memref<64x256xf32, #tpu.memory_space<vmem>>, %arg3: memref<1x256xf32, #tpu.memory_space<vmem>>, %arg4: memref<1x256xf32, #tpu.memory_space<vmem>>, %arg5: memref<256x512xbf16, #tpu.memory_space<vmem>>, %arg6: memref<1x512xf32, #tpu.memory_space<vmem>>, %arg7: memref<512x256xbf16, #tpu.memory_space<vmem>>, %arg8: memref<1x256xf32, #tpu.memory_space<vmem>>, %arg9: memref<256x256xbf16, #tpu.memory_space<vmem>>, %arg10: memref<1x256xf32, #tpu.memory_space<vmem>>, %arg11: memref<64x256xf32, #tpu.memory_space<vmem>>, %arg12: memref<64x256xf32, #tpu.memory_space<vmem>>) attributes {dimension_semantics = [#tpu.dimension_semantics<arbitrary>], iteration_bounds = array<i64: 1>, scalar_prefetch = 0 : i64, scratch_operands = 0 : i64, tpu.core_type = #tpu.core_type<tc>, window_params = [{pipeline_mode = #tpu.pipeline_mode<synchronous>, transform_indices = @transform_0, window_bounds = array<i64: 64, 256>}, {pipeline_mode = #tpu.pipeline_mode<synchronous>, transform_indices = @transform_1, window_bounds = array<i64: 64, 256>}, {pipeline_mode = #tpu.pipeline_mode<synchronous>, transform_indices = @transform_2, window_bounds = array<i64: 1, 256>}, {pipeline_mode = #tpu.pipeline_mode<synchronous>, transform_indices = @transform_3, window_bounds = array<i64: 1, 256>}, {pipeline_mode = #tpu.pipeline_mode<synchronous>, transform_indices = @transform_4, window_bounds = array<i64: 256, 512>}, {pipeline_mode = #tpu.pipeline_mode<synchronous>, transform_indices = @transform_5, window_bounds = array<i64: 1, 512>}, {pipeline_mode = #tpu.pipeline_mode<synchronous>, transform_indices = @transform_6, window_bounds = array<i64: 512, 256>}, {pipeline_mode = #tpu.pipeline_mode<synchronous>, transform_indices = @transform_7, window_bounds = array<i64: 1, 256>}, {pipeline_mode = #tpu.pipeline_mode<synchronous>, transform_indices = @transform_8, window_bounds = array<i64: 256, 256>}, {pipeline_mode = #tpu.pipeline_mode<synchronous>, transform_indices = @transform_9, window_bounds = array<i64: 1, 256>}, {pipeline_mode = #tpu.pipeline_mode<synchronous>, transform_indices = @transform_10, window_bounds = array<i64: 64, 256>}, {pipeline_mode = #tpu.pipeline_mode<synchronous>, transform_indices = @transform_11, window_bounds = array<i64: 64, 256>}]} {
    %c0 = arith.constant 0 : index
    %c0_0 = arith.constant 0 : index
    %0 = vector.load %arg1[%c0, %c0_0] : memref<64x256xf32, #tpu.memory_space<vmem>>, vector<64x256xf32>
    %c0_1 = arith.constant 0 : index
    %c0_2 = arith.constant 0 : index
    %1 = vector.load %arg3[%c0_1, %c0_2] : memref<1x256xf32, #tpu.memory_space<vmem>>, vector<1x256xf32>
    %c0_3 = arith.constant 0 : index
    %c0_4 = arith.constant 0 : index
    %2 = vector.load %arg4[%c0_3, %c0_4] : memref<1x256xf32, #tpu.memory_space<vmem>>, vector<1x256xf32>
    %cst = arith.constant dense<0.000000e+00> : vector<64xf32>
    %3 = vector.multi_reduction <add>, %0, %cst [1] : vector<64x256xf32> to vector<64xf32>
    %4 = vector.shape_cast %3 : vector<64xf32> to vector<64x1xf32>
    %cst_5 = arith.constant 2.560000e+02 : f32
    %5 = vector.broadcast %cst_5 : f32 to vector<64x1xf32>
    %6 = arith.divf %4, %5 : vector<64x1xf32>
    %7 = vector.broadcast %6 : vector<64x1xf32> to vector<64x256xf32>
    %8 = arith.subf %0, %7 : vector<64x256xf32>
    %9 = arith.mulf %8, %8 : vector<64x256xf32>
    %cst_6 = arith.constant dense<0.000000e+00> : vector<64xf32>
    %10 = vector.multi_reduction <add>, %9, %cst_6 [1] : vector<64x256xf32> to vector<64xf32>
    %11 = vector.shape_cast %10 : vector<64xf32> to vector<64x1xf32>
    %cst_7 = arith.constant 2.560000e+02 : f32
    %12 = vector.broadcast %cst_7 : f32 to vector<64x1xf32>
    %13 = arith.divf %11, %12 : vector<64x1xf32>
    %14 = vector.broadcast %6 : vector<64x1xf32> to vector<64x256xf32>
    %15 = arith.subf %0, %14 : vector<64x256xf32>
    %cst_8 = arith.constant 9.99999974E-6 : f32
    %16 = vector.broadcast %cst_8 : f32 to vector<64x1xf32>
    %17 = arith.addf %13, %16 : vector<64x1xf32>
    %18 = math.rsqrt %17 : vector<64x1xf32>
    %19 = vector.broadcast %18 : vector<64x1xf32> to vector<64x256xf32>
    %20 = arith.mulf %15, %19 : vector<64x256xf32>
    %21 = vector.broadcast %1 : vector<1x256xf32> to vector<64x256xf32>
    %22 = arith.mulf %20, %21 : vector<64x256xf32>
    %23 = vector.broadcast %2 : vector<1x256xf32> to vector<64x256xf32>
    %24 = arith.addf %22, %23 : vector<64x256xf32>
    %25 = arith.truncf %24 : vector<64x256xf32> to vector<64x256xbf16>
    %c0_9 = arith.constant 0 : index
    %c0_10 = arith.constant 0 : index
    %26 = vector.load %arg5[%c0_9, %c0_10] : memref<256x512xbf16, #tpu.memory_space<vmem>>, vector<256x512xbf16>
    %cst_11 = arith.constant dense<0.000000e+00> : vector<64x512xf32>
    %27 = tpu.matmul %25, %26, %cst_11 {dimension_numbers = #tpu.dot_dimension_numbers<[1], [0], [0], [1], [0, 0, 1, 1], [], []>} : vector<64x256xbf16>, vector<256x512xbf16>, vector<64x512xf32> -> vector<64x512xf32>
    %c0_12 = arith.constant 0 : index
    %c0_13 = arith.constant 0 : index
    %28 = vector.load %arg6[%c0_12, %c0_13] : memref<1x512xf32, #tpu.memory_space<vmem>>, vector<1x512xf32>
    %29 = vector.broadcast %28 : vector<1x512xf32> to vector<64x512xf32>
    %30 = arith.addf %27, %29 : vector<64x512xf32>
    %31 = math.absf %30 : vector<64x512xf32>
    %cst_14 = arith.constant 0.000000e+00 : f32
    %32 = vector.broadcast %cst_14 : f32 to vector<64x512xf32>
    %33 = arith.subf %32, %31 : vector<64x512xf32>
    %34 = math.exp %33 : vector<64x512xf32>
    %cst_15 = arith.constant 1.000000e+00 : f32
    %35 = vector.broadcast %cst_15 : f32 to vector<64x512xf32>
    %36 = arith.addf %35, %34 : vector<64x512xf32>
    %37 = math.log %36 : vector<64x512xf32>
    %cst_16 = arith.constant 0.000000e+00 : f32
    %38 = vector.broadcast %cst_16 : f32 to vector<64x512xf32>
    %39 = arith.maximumf %30, %38 : vector<64x512xf32>
    %40 = arith.addf %37, %39 : vector<64x512xf32>
    %41 = math.tanh %40 : vector<64x512xf32>
    %42 = arith.mulf %30, %41 : vector<64x512xf32>
    %43 = arith.truncf %42 : vector<64x512xf32> to vector<64x512xbf16>
    %c0_17 = arith.constant 0 : index
    %c0_18 = arith.constant 0 : index
    %44 = vector.load %arg7[%c0_17, %c0_18] : memref<512x256xbf16, #tpu.memory_space<vmem>>, vector<512x256xbf16>
    %cst_19 = arith.constant dense<0.000000e+00> : vector<64x256xf32>
    %45 = tpu.matmul %43, %44, %cst_19 {dimension_numbers = #tpu.dot_dimension_numbers<[1], [0], [0], [1], [0, 0, 1, 1], [], []>} : vector<64x512xbf16>, vector<512x256xbf16>, vector<64x256xf32> -> vector<64x256xf32>
    %c0_20 = arith.constant 0 : index
    %c0_21 = arith.constant 0 : index
    %46 = vector.load %arg8[%c0_20, %c0_21] : memref<1x256xf32, #tpu.memory_space<vmem>>, vector<1x256xf32>
    %47 = vector.broadcast %46 : vector<1x256xf32> to vector<64x256xf32>
    %48 = arith.addf %45, %47 : vector<64x256xf32>
    %c0_22 = arith.constant 0 : index
    %c0_23 = arith.constant 0 : index
    %49 = vector.load %arg11[%c0_22, %c0_23] : memref<64x256xf32, #tpu.memory_space<vmem>>, vector<64x256xf32>
    tpu.vector_store %arg11[%c0_22, %c0_23], %48 {strides = array<i32>} : memref<64x256xf32, #tpu.memory_space<vmem>>, vector<64x256xf32>,
    %c0_24 = arith.constant 0 : index
    %c0_25 = arith.constant 0 : index
    %50 = vector.load %arg2[%c0_24, %c0_25] : memref<64x256xf32, #tpu.memory_space<vmem>>, vector<64x256xf32>
    %51 = arith.truncf %50 : vector<64x256xf32> to vector<64x256xbf16>
    %c0_26 = arith.constant 0 : index
    %c0_27 = arith.constant 0 : index
    %52 = vector.load %arg9[%c0_26, %c0_27] : memref<256x256xbf16, #tpu.memory_space<vmem>>, vector<256x256xbf16>
    %cst_28 = arith.constant dense<0.000000e+00> : vector<64x256xf32>
    %53 = tpu.matmul %51, %52, %cst_28 {dimension_numbers = #tpu.dot_dimension_numbers<[1], [0], [0], [1], [0, 0, 1, 1], [], []>} : vector<64x256xbf16>, vector<256x256xbf16>, vector<64x256xf32> -> vector<64x256xf32>
    %c0_29 = arith.constant 0 : index
    %c0_30 = arith.constant 0 : index
    %54 = vector.load %arg10[%c0_29, %c0_30] : memref<1x256xf32, #tpu.memory_space<vmem>>, vector<1x256xf32>
    %55 = vector.broadcast %54 : vector<1x256xf32> to vector<64x256xf32>
    %56 = arith.addf %53, %55 : vector<64x256xf32>
    %c0_31 = arith.constant 0 : index
    %c0_32 = arith.constant 0 : index
    %57 = vector.load %arg12[%c0_31, %c0_32] : memref<64x256xf32, #tpu.memory_space<vmem>>, vector<64x256xf32>
    tpu.vector_store %arg12[%c0_31, %c0_32], %56 {strides = array<i32>} : memref<64x256xf32, #tpu.memory_space<vmem>>, vector<64x256xf32>,
    return
  }
  func.func @transform_0(%arg0: i32) -> (i32, i32) {
    %c0_i32 = arith.constant 0 : i32
    %c0_i32_0 = arith.constant 0 : i32
    %c0_i32_1 = arith.constant 0 : i32
    return %c0_i32, %c0_i32_0 : i32, i32
  }
  func.func @transform_1(%arg0: i32) -> (i32, i32) {
    %c0_i32 = arith.constant 0 : i32
    %c0_i32_0 = arith.constant 0 : i32
    %c0_i32_1 = arith.constant 0 : i32
    return %c0_i32, %c0_i32_0 : i32, i32
  }
  func.func @transform_2(%arg0: i32) -> (i32, i32) {
    %c0_i32 = arith.constant 0 : i32
    %c0_i32_0 = arith.constant 0 : i32
    %c0_i32_1 = arith.constant 0 : i32
    return %c0_i32, %c0_i32_0 : i32, i32
  }
  func.func @transform_3(%arg0: i32) -> (i32, i32) {
    %c0_i32 = arith.constant 0 : i32
    %c0_i32_0 = arith.constant 0 : i32
    %c0_i32_1 = arith.constant 0 : i32
    return %c0_i32, %c0_i32_0 : i32, i32
  }
  func.func @transform_4(%arg0: i32) -> (i32, i32) {
    %c0_i32 = arith.constant 0 : i32
    %c0_i32_0 = arith.constant 0 : i32
    %c0_i32_1 = arith.constant 0 : i32
    return %c0_i32, %c0_i32_0 : i32, i32
  }
  func.func @transform_5(%arg0: i32) -> (i32, i32) {
    %c0_i32 = arith.constant 0 : i32
    %c0_i32_0 = arith.constant 0 : i32
    %c0_i32_1 = arith.constant 0 : i32
    return %c0_i32, %c0_i32_0 : i32, i32
  }
  func.func @transform_6(%arg0: i32) -> (i32, i32) {
    %c0_i32 = arith.constant 0 : i32
    %c0_i32_0 = arith.constant 0 : i32
    %c0_i32_1 = arith.constant 0 : i32
    return %c0_i32, %c0_i32_0 : i32, i32
  }
  func.func @transform_7(%arg0: i32) -> (i32, i32) {
    %c0_i32 = arith.constant 0 : i32
    %c0_i32_0 = arith.constant 0 : i32
    %c0_i32_1 = arith.constant 0 : i32
    return %c0_i32, %c0_i32_0 : i32, i32
  }
  func.func @transform_8(%arg0: i32) -> (i32, i32) {
    %c0_i32 = arith.constant 0 : i32
    %c0_i32_0 = arith.constant 0 : i32
    %c0_i32_1 = arith.constant 0 : i32
    return %c0_i32, %c0_i32_0 : i32, i32
  }
  func.func @transform_9(%arg0: i32) -> (i32, i32) {
    %c0_i32 = arith.constant 0 : i32
    %c0_i32_0 = arith.constant 0 : i32
    %c0_i32_1 = arith.constant 0 : i32
    return %c0_i32, %c0_i32_0 : i32, i32
  }
  func.func @transform_10(%arg0: i32) -> (i32, i32) {
    %c0_i32 = arith.constant 0 : i32
    %c0_i32_0 = arith.constant 0 : i32
    %c0_i32_1 = arith.constant 0 : i32
    return %c0_i32, %c0_i32_0 : i32, i32
  }
  func.func @transform_11(%arg0: i32) -> (i32, i32) {
    %c0_i32 = arith.constant 0 : i32
    %c0_i32_0 = arith.constant 0 : i32
    %c0_i32_1 = arith.constant 0 : i32
    return %c0_i32, %c0_i32_0 : i32, i32
  }
}

</mosaic_0001>

<bundles_post_ra>
// kernel: tpu_custom_call.1
= control target key start
LH: loop header
LB: loop body
LE: loop exit
PB: predicated region body
PF: predicated region fallthrough
CT: control target
= control target key end

     0   :  { %17 = vsyncpa [#allocation3], 0  ;;  %s3757_s0 = inlined_call_operand.hbm [shape: f32[64,256], index: 0, kind: input, shape index: {}]   ;;  %s3758_s1 = inlined_call_operand.hbm [shape: f32[64,256], index: 1, kind: input, shape index: {}]   ;;  %s3759_s2 = inlined_call_operand.vmem [shape: f32[1,256], index: 2, kind: input, shape index: {}]   ;;  %s3760_s3 = inlined_call_operand.vmem [shape: f32[1,256], index: 3, kind: input, shape index: {}]   ;;  %s3761_s4 = inlined_call_operand.hbm [shape: bf16[256,512], index: 4, kind: input, shape index: {}]   ;;  %s3762_s5 = inlined_call_operand.vmem [shape: f32[1,512], index: 5, kind: input, shape index: {}]   ;;  %s3763_s6 = inlined_call_operand.hbm [shape: bf16[512,256], index: 6, kind: input, shape index: {}]   ;;  %s3764_s7 = inlined_call_operand.vmem [shape: f32[1,256], index: 7, kind: input, shape index: {}]   ;;  %s3765_s8 = inlined_call_operand.hbm [shape: bf16[256,256], index: 8, kind: input, shape index: {}]   ;;  %s3766_s9 = inlined_call_operand.vmem [shape: f32[1,256], index: 9, kind: input, shape index: {}]   ;;  %s3767_s10 = inlined_call_operand.hbm [shape: f32[64,256], index: 10, kind: output, shape index: {0}]   ;;  %s3768_s11 = inlined_call_operand.hbm [shape: f32[64,256], index: 11, kind: output, shape index: {1}]  }
   0x1   :  { %18 = vsyncpa [#allocation6], 0 }
   0x2   :  { %19 = vsyncpa [#allocation9], 0 }
   0x3   :  { %20 = vsyncpa [#allocation4], 0 }
   0x4   :  { %21 = vsyncpa [#allocation13], 0  ;;  %s2961_s17 = smov [#allocation5]   ;;  %s2962_s19 = smov [#allocation8]  }
   0x5   :  { %s39_s18 = sshll.u32 %s2961_s17, 4  ;;  %s69_s20 = sshll.u32 %s2962_s19, 4  ;;  %s40_s18 = int_to_ptr.vmem [resolvable:$true] %s39_s18  ;;  %s3032_s20 = int_to_ptr.vmem [resolvable:$true] %s69_s20 }
   0x6   :  { %s2797_s23 = scalar_lea.hbm %s3758_s1, 2048 }
   0x7   :  { %p2798_p0 = scmp.ne.s32.totalorder %s3758_s1, %s2797_s23  ;;  %p2801_p1 = scmp.lt.u32.totalorder %s2797_s23, %s3758_s1 }
   0x9   :  { %p2803_p2 = pnand %p2801_p1, %p2798_p0 }
   0xb   :  { %2806 = shalt.err (!%p2803_p2)
}
   0xc   :  { %s2807_s28 = scalar_lea.vmem %s40_s18, 2048  ;;  %p2812_p4 = scmp.lt.s32.totalorder %s40_s18, %s40_s18 }
   0xd   :  { %p2808_p3 = scmp.ne.s32.totalorder %s40_s18, %s2807_s28  ;;  %p2813_p5 = scmp.lt.s32.totalorder %s2807_s28, %s2807_s28 }
   0xf   :  { %p2814_p6 = por %p2813_p5, %p2812_p4 }
  0x11   :  { %p2815_p7 = pnand %p2814_p6, %p2808_p3 }
  0x13   :  { %2818 = shalt.err (!%p2815_p7)
}
  0x14   :  { %s2963_s29 = smov 256   ;;  %s2964_s30 = smov 16  }
  0x15   :  { %45 = dma.hbm_to_vmem [thread:$0]  %s3758_s1, 2048, %s40_s18, [#allocation6], %s2963_s29, %s2963_s29, %s2964_s30  }
  0x16   :  { %s2819_s16 = scalar_lea.hbm %s3763_s6, 8192 }
  0x17   :  { %p2820_p8 = scmp.ne.s32.totalorder %s3763_s6, %s2819_s16  ;;  %p2823_p9 = scmp.lt.u32.totalorder %s2819_s16, %s3763_s6 }
  0x19   :  { %p2825_p10 = pnand %p2823_p9, %p2820_p8 }
  0x1b   :  { %2828 = shalt.err (!%p2825_p10)
}
  0x1c   :  { %s2829_s23 = scalar_lea.vmem %s3032_s20, 8192  ;;  %p2834_p12 = scmp.lt.s32.totalorder %s3032_s20, %s3032_s20 }
  0x1d   :  { %p2830_p11 = scmp.ne.s32.totalorder %s3032_s20, %s2829_s23  ;;  %p2835_p13 = scmp.lt.s32.totalorder %s2829_s23, %s2829_s23 }
  0x1f   :  { %p2836_p0 = por %p2835_p13, %p2834_p12 }
  0x21   :  { %p2837_p1 = pnand %p2836_p0, %p2830_p11 }
  0x23   :  { %2840 = shalt.err (!%p2837_p1)
}
  0x24   :  { %s2965_s1 = smov 128   ;;  %s2966_s18 = smov 8  }
  0x25   :  { %75 = dma.hbm_to_vmem [thread:$0]  %s3763_s6, 8192, %s3032_s20, [#allocation9], %s2965_s1, %s2965_s1, %s2966_s18  }
  0x26   :  { %s2967_s26 = smov [#allocation2]   ;;  %s2968_s28 = smov [#allocation7]  }
  0x27   :  { %s27_s27 = sshll.u32 %s2967_s26, 4  ;;  %s55_s12 = sshll.u32 %s2968_s28, 4  ;;  %s28_s27 = int_to_ptr.vmem [resolvable:$true] %s27_s27  ;;  %s3069_s12 = int_to_ptr.vmem [resolvable:$true] %s55_s12 }
  0x28   :  { %s2841_s15 = scalar_lea.hbm %s3757_s0, 2048 }
  0x29   :  { %p2842_p2 = scmp.ne.s32.totalorder %s3757_s0, %s2841_s15  ;;  %p2845_p3 = scmp.lt.u32.totalorder %s2841_s15, %s3757_s0 }
  0x2b   :  { %p2847_p4 = pnand %p2845_p3, %p2842_p2 }
  0x2d   :  { %2850 = shalt.err (!%p2847_p4)
}
  0x2e   :  { %s2851_s6 = scalar_lea.vmem %s28_s27, 2048  ;;  %p2856_p6 = scmp.lt.s32.totalorder %s28_s27, %s28_s27 }
  0x2f   :  { %p2852_p5 = scmp.ne.s32.totalorder %s28_s27, %s2851_s6  ;;  %p2857_p7 = scmp.lt.s32.totalorder %s2851_s6, %s2851_s6 }
  0x31   :  { %p2858_p8 = por %p2857_p7, %p2856_p6 }
  0x33   :  { %p2859_p9 = pnand %p2858_p8, %p2852_p5 }
  0x35   :  { %2862 = shalt.err (!%p2859_p9)
}
  0x36   :  { %33 = dma.hbm_to_vmem [thread:$0]  %s3757_s0, 2048, %s28_s27, [#allocation3], %s2963_s29, %s2963_s29, %s2964_s30  }
  0x37   :  { %s2863_s25 = scalar_lea.hbm %s3761_s4, 8192 }
  0x38   :  { %p2864_p10 = scmp.ne.s32.totalorder %s3761_s4, %s2863_s25  ;;  %p2867_p11 = scmp.lt.u32.totalorder %s2863_s25, %s3761_s4 }
  0x3a   :  { %p2869_p12 = pnand %p2867_p11, %p2864_p10 }
  0x3c   :  { %2872 = shalt.err (!%p2869_p12)
}
  0x3d   :  { %s2873_s15 = scalar_lea.vmem %s3069_s12, 8192  ;;  %p2878_p0 = scmp.lt.s32.totalorder %s3069_s12, %s3069_s12 }
  0x3e   :  { %p2874_p13 = scmp.ne.s32.totalorder %s3069_s12, %s2873_s15  ;;  %p2879_p1 = scmp.lt.s32.totalorder %s2873_s15, %s2873_s15 }
  0x40   :  { %p2880_p2 = por %p2879_p1, %p2878_p0 }
  0x42   :  { %p2881_p3 = pnand %p2880_p2, %p2874_p13 }
  0x44   :  { %2884 = shalt.err (!%p2881_p3)
}
  0x45   :  { %61 = dma.hbm_to_vmem [thread:$0]  %s3761_s4, 8192, %s3069_s12, [#allocation6], %s2963_s29, %s2963_s29, %s2964_s30  }
  0x46   :  { %s2969_s16 = smov [#allocation10]   ;;  %s2885_s6 = scalar_lea.hbm %s3765_s8, 4096 }
  0x47   :  { %s83_s17 = sshll.u32 %s2969_s16, 4  ;;  %p2886_p4 = scmp.ne.s32.totalorder %s3765_s8, %s2885_s6  ;;  %s84_s17 = int_to_ptr.vmem [resolvable:$true] %s83_s17 }
  0x48   :  { %p2889_p5 = scmp.lt.u32.totalorder %s2885_s6, %s3765_s8 }
  0x4a   :  { %p2891_p6 = pnand %p2889_p5, %p2886_p4 }
  0x4c   :  { %2894 = shalt.err (!%p2891_p6)
}
  0x4d   :  { %s2895_s25 = scalar_lea.vmem %s84_s17, 4096  ;;  %p2900_p8 = scmp.lt.s32.totalorder %s84_s17, %s84_s17 }
  0x4e   :  { %p2896_p7 = scmp.ne.s32.totalorder %s84_s17, %s2895_s25  ;;  %p2901_p9 = scmp.lt.s32.totalorder %s2895_s25, %s2895_s25 }
  0x50   :  { %p2902_p10 = por %p2901_p9, %p2900_p8 }
  0x52   :  { %p2903_p11 = pnand %p2902_p10, %p2896_p7 }
  0x54   :  { %2906 = shalt.err (!%p2903_p11)
}
  0x55   :  { %89 = dma.hbm_to_vmem [thread:$0]  %s3765_s8, 4096, %s84_s17, [#allocation9], %s2965_s1, %s2965_s1, %s2966_s18  }
  0x56   :  { %2951 = dma.done.wait [#allocation3], 2048  }
  0x57   :  { %2952 = vsyncadd [#allocation3], 4294965248 }
  0x58   :  { %2953 = dma.done.wait [#allocation6], 10240  }
  0x59   :  { %2954 = vsyncadd [#allocation6], 4294957056 }
  0x5a   :  { %2955 = dma.done.wait [#allocation9], 12288  }
  0x5b   :  { %2956 = vsyncadd [#allocation9], 4294955008  ;;  %v3121_v0 = vld [vmem:[#allocation2] sm:$0xff]  ;;  %v3123_v1 = vld [vmem:[#allocation2 + $0x8] sm:$0xff] }
  0x5c   :  { %v3125_v2 = vld [vmem:[#allocation2 + $0x20] sm:$0xff]  ;;  %v125_v3 = vadd.f32 %v3123_v1, %v3121_v0  ;;  %v3129_v4 = vld [vmem:[#allocation2 + $0x28] sm:$0xff]  ;;  %v3131_v5 = vld [vmem:[#allocation2 + $0x10] sm:$0xff] }
  0x5d   :  { %v3133_v6 = vld [vmem:[#allocation2 + $0x18] sm:$0xff]  ;;  %v131_v7 = vadd.f32 %v3129_v4, %v3125_v2  ;;  %v3137_v8 = vld [vmem:[#allocation2 + $0x30] sm:$0xff]  ;;  %v3145_v12 = vld [vmem:[#allocation2 + $0x40] sm:$0xff] }
  0x5e   :  { %v3139_v9 = vld [vmem:[#allocation2 + $0x38] sm:$0xff]  ;;  %126 = vadd.xlane.f32.xlu0 %v125_v3  ;;  %v128_v10 = vadd.f32 %v3133_v6, %v3131_v5  ;;  %v3147_v13 = vld [vmem:[#allocation2 + $0x48] sm:$0xff]  ;;  %v3149_v14 = vld [vmem:[#allocation2 + $0x50] sm:$0xff] }
  0x5f   :  { %132 = vadd.xlane.f32.xlu1 %v131_v7  ;;  %v134_v11 = vadd.f32 %v3139_v9, %v3137_v8  ;;  %v3151_v15 = vld [vmem:[#allocation2 + $0x58] sm:$0xff]  ;;  %v3153_v16 = vld [vmem:[#allocation2 + $0x60] sm:$0xff]  ;;  %v3155_v17 = vld [vmem:[#allocation2 + $0x68] sm:$0xff]  ;;  %v137_v18 = vadd.f32 %v3147_v13, %v3145_v12 }
  0x60   :  { %v3159_v19 = vld [vmem:[#allocation2 + $0x70] sm:$0xff]  ;;  %v3161_v20 = vld [vmem:[#allocation2 + $0x78] sm:$0xff]  ;;  %v140_v21 = vadd.f32 %v3151_v15, %v3149_v14  ;;  %v143_v22 = vadd.f32 %v3155_v17, %v3153_v16 }
  0x61   :  { %v146_v23 = vadd.f32 %v3161_v20, %v3159_v19  ;;  %v2349_v24 = vld [vmem:[#allocation7 + $0x4] ss:$16 sps:$4 sm:$0xff]   ;;  %v2351_v25 = vld [vmem:[#allocation7 + $0xc] ss:$16 sps:$4 sm:$0xff]   ;;  %v2353_v26 = vld [vmem:[#allocation7] ss:$16 sps:$4 sm:$0xff]  }
  0x62   :  { %129 = vadd.xlane.f32.xlu0 %v128_v10  ;;  %v2354_v27 = vld [vmem:[#allocation7 + $0x8] ss:$16 sps:$4 sm:$0xff]   ;;  %v2355_v28 = vld [vmem:[#allocation7 + $0x24] ss:$16 sps:$4 sm:$0xff]   ;;  %v2357_v29 = vld [vmem:[#allocation7 + $0x2c] ss:$16 sps:$4 sm:$0xff]   ;;  %722 = vmatprep.subr.bf16.mxu0 %v2349_v24 }
  0x63   :  { %135 = vadd.xlane.f32.xlu1 %v134_v11  ;;  %795 = vmatprep.subr.bf16.mxu1 %v2351_v25  ;;  %v2359_v30 = vld [vmem:[#allocation7 + $0x20] ss:$16 sps:$4 sm:$0xff]   ;;  %v2360_v31 = vld [vmem:[#allocation7 + $0x28] ss:$16 sps:$4 sm:$0xff]   ;;  %v2361_v32 = vld [vmem:[#allocation7 + $0x44] ss:$16 sps:$4 sm:$0xff]  }
  0x64   :  { %723 = vmatpush1.bf16.msra.mxu0 %v2353_v26  ;;  %796 = vmatpush1.bf16.msra.mxu1 %v2354_v27  ;;  %v2363_v33 = vld [vmem:[#allocation7 + $0x4c] ss:$16 sps:$4 sm:$0xff]   ;;  %v2365_v34 = vld [vmem:[#allocation7 + $0x40] ss:$16 sps:$4 sm:$0xff]   ;;  %v2366_v35 = vld [vmem:[#allocation7 + $0x48] ss:$16 sps:$4 sm:$0xff]  }
  0x65   :  { %724 = vmatprep.subr.bf16.mxu0 %v2355_v28  ;;  %797 = vmatprep.subr.bf16.mxu1 %v2357_v29  ;;  %v2367_v36 = vld [vmem:[#allocation7 + $0x64] ss:$16 sps:$4 sm:$0xff]   ;;  %v2369_v37 = vld [vmem:[#allocation7 + $0x6c] ss:$16 sps:$4 sm:$0xff]   ;;  %v2371_v38 = vld [vmem:[#allocation7 + $0x60] ss:$16 sps:$4 sm:$0xff]  }
  0x66   :  { %138 = vadd.xlane.f32.xlu0 %v137_v18  ;;  %v2372_v39 = vld [vmem:[#allocation7 + $0x68] ss:$16 sps:$4 sm:$0xff]   ;;  %v2373_v40 = vld [vmem:[#allocation7 + $0x84] ss:$16 sps:$4 sm:$0xff]   ;;  %v2375_v41 = vld [vmem:[#allocation7 + $0x8c] ss:$16 sps:$4 sm:$0xff]  }
  0x67   :  { %141 = vadd.xlane.f32.xlu1 %v140_v21  ;;  %v2377_v42 = vld [vmem:[#allocation7 + $0x80] ss:$16 sps:$4 sm:$0xff]   ;;  %v2378_v43 = vld [vmem:[#allocation7 + $0x88] ss:$16 sps:$4 sm:$0xff]   ;;  %v2379_v44 = vld [vmem:[#allocation7 + $0xa4] ss:$16 sps:$4 sm:$0xff]  }
  0x68   :  { %725 = vmatpush1.bf16.msra.mxu0 %v2359_v30  ;;  %798 = vmatpush1.bf16.msra.mxu1 %v2360_v31  ;;  %v2381_v45 = vld [vmem:[#allocation7 + $0xac] ss:$16 sps:$4 sm:$0xff]   ;;  %v2383_v46 = vld [vmem:[#allocation7 + $0xa0] ss:$16 sps:$4 sm:$0xff]   ;;  %v2384_v47 = vld [vmem:[#allocation7 + $0xa8] ss:$16 sps:$4 sm:$0xff]  }
  0x69   :  { %726 = vmatprep.subr.bf16.mxu0 %v2361_v32  ;;  %799 = vmatprep.subr.bf16.mxu1 %v2363_v33  ;;  %v2385_v48 = vld [vmem:[#allocation7 + $0xc4] ss:$16 sps:$4 sm:$0xff]   ;;  %v2387_v49 = vld [vmem:[#allocation7 + $0xcc] ss:$16 sps:$4 sm:$0xff]   ;;  %v2389_v50 = vld [vmem:[#allocation7 + $0xc0] ss:$16 sps:$4 sm:$0xff]  }
  0x6a   :  { %144 = vadd.xlane.f32.xlu0 %v143_v22  ;;  %v2390_v51 = vld [vmem:[#allocation7 + $0xc8] ss:$16 sps:$4 sm:$0xff]   ;;  %v2391_v52 = vld [vmem:[#allocation7 + $0xe4] ss:$16 sps:$4 sm:$0xff]   ;;  %v2393_v53 = vld [vmem:[#allocation7 + $0xec] ss:$16 sps:$4 sm:$0xff]  }
  0x6b   :  { %147 = vadd.xlane.f32.xlu1 %v146_v23  ;;  %v2395_v54 = vld [vmem:[#allocation7 + $0xe0] ss:$16 sps:$4 sm:$0xff]   ;;  %v2396_v55 = vld [vmem:[#allocation7 + $0xe8] ss:$16 sps:$4 sm:$0xff]   ;;  %v2397_v56 = vld [vmem:[#allocation7 + $0x104] ss:$16 sps:$4 sm:$0xff]  }
  0x6c   :  { %727 = vmatpush1.bf16.msra.mxu0 %v2365_v34  ;;  %800 = vmatpush1.bf16.msra.mxu1 %v2366_v35  ;;  %v2399_v57 = vld [vmem:[#allocation7 + $0x10c] ss:$16 sps:$4 sm:$0xff]   ;;  %v2401_v58 = vld [vmem:[#allocation7 + $0x100] ss:$16 sps:$4 sm:$0xff]   ;;  %v2402_v59 = vld [vmem:[#allocation7 + $0x108] ss:$16 sps:$4 sm:$0xff]  }
  0x6d   :  { %728 = vmatprep.subr.bf16.mxu0 %v2367_v36  ;;  %801 = vmatprep.subr.bf16.mxu1 %v2369_v37 }
  0x70   :  { %729 = vmatpush1.bf16.msra.mxu0 %v2371_v38  ;;  %802 = vmatpush1.bf16.msra.mxu1 %v2372_v39 }
  0x71   :  { %730 = vmatprep.subr.bf16.mxu0 %v2373_v40  ;;  %803 = vmatprep.subr.bf16.mxu1 %v2375_v41 }
  0x74   :  { %731 = vmatpush1.bf16.msra.mxu0 %v2377_v42  ;;  %804 = vmatpush1.bf16.msra.mxu1 %v2378_v43 }
  0x75   :  { %732 = vmatprep.subr.bf16.mxu0 %v2379_v44  ;;  %805 = vmatprep.subr.bf16.mxu1 %v2381_v45 }
  0x78   :  { %733 = vmatpush1.bf16.msra.mxu0 %v2383_v46  ;;  %806 = vmatpush1.bf16.msra.mxu1 %v2384_v47 }
  0x79   :  { %734 = vmatprep.subr.bf16.mxu0 %v2385_v48  ;;  %807 = vmatprep.subr.bf16.mxu1 %v2387_v49 }
  0x7c   :  { %735 = vmatpush1.bf16.msra.mxu0 %v2389_v50  ;;  %808 = vmatpush1.bf16.msra.mxu1 %v2390_v51 }
  0x7d   :  { %736 = vmatprep.subr.bf16.mxu0 %v2391_v52  ;;  %809 = vmatprep.subr.bf16.mxu1 %v2393_v53  ;;  %v2403_v52 = vld [vmem:[#allocation7 + $0x124] ss:$16 sps:$4 sm:$0xff]   ;;  %v2405_v53 = vld [vmem:[#allocation7 + $0x12c] ss:$16 sps:$4 sm:$0xff]  }
  0x80   :  { %737 = vmatpush1.bf16.msra.mxu0 %v2395_v54  ;;  %810 = vmatpush1.bf16.msra.mxu1 %v2396_v55  ;;  %v2407_v54 = vld [vmem:[#allocation7 + $0x120] ss:$16 sps:$4 sm:$0xff]   ;;  %v2408_v55 = vld [vmem:[#allocation7 + $0x128] ss:$16 sps:$4 sm:$0xff]  }
  0x81   :  { %738 = vmatprep.subr.bf16.mxu0 %v2397_v56  ;;  %811 = vmatprep.subr.bf16.mxu1 %v2399_v57  ;;  %v2409_v56 = vld [vmem:[#allocation7 + $0x144] ss:$16 sps:$4 sm:$0xff]   ;;  %v2411_v57 = vld [vmem:[#allocation7 + $0x14c] ss:$16 sps:$4 sm:$0xff]  }
  0x84   :  { %739 = vmatpush1.bf16.msra.mxu0 %v2401_v58  ;;  %812 = vmatpush1.bf16.msra.mxu1 %v2402_v59  ;;  %v2413_v58 = vld [vmem:[#allocation7 + $0x140] ss:$16 sps:$4 sm:$0xff]   ;;  %v2414_v59 = vld [vmem:[#allocation7 + $0x148] ss:$16 sps:$4 sm:$0xff]  }
  0x85   :  { %740 = vmatprep.subr.bf16.mxu0 %v2403_v52  ;;  %813 = vmatprep.subr.bf16.mxu1 %v2405_v53 }
  0x88   :  { %741 = vmatpush1.bf16.msra.mxu0 %v2407_v54  ;;  %814 = vmatpush1.bf16.msra.mxu1 %v2408_v55  ;;  %v123_v54 = vld [vmem:[%s3759_s2] sm:$0x3] }
  0x89   :  { %742 = vmatprep.subr.bf16.mxu0 %v2409_v56  ;;  %815 = vmatprep.subr.bf16.mxu1 %v2411_v57 }
  0x8c   :  { %743 = vmatpush1.bf16.msra.mxu0 %v2413_v58  ;;  %816 = vmatpush1.bf16.msra.mxu1 %v2414_v59  ;;  %v124_v59 = vld [vmem:[%s3760_s3] sm:$0x3] }
  0xeb   :  { %v127_v60 = vpop.xlane.xlu0 %126 }
  0xec   :  { %v150_v61 = vmul.f32 0.00390625, %v127_v60  ;;  %v133_v62 = vpop.xlane.xlu1 %132  ;;  %v2415_v60 = vld [vmem:[#allocation7 + $0x164] ss:$16 sps:$4 sm:$0xff]  }
  0xed   :  { %v152_v63 = vmul.f32 0.00390625, %v133_v62  ;;  %v2419_v62 = vld [vmem:[#allocation7 + $0x160] ss:$16 sps:$4 sm:$0xff]   ;;  %744 = vmatprep.subr.bf16.mxu0 %v2415_v60 }
  0xee   :  { %v3170_v3 = vsub.f32 %v3121_v0, %v150_v61  ;;  %v3173_v7 = vsub.f32 %v3123_v1, %v150_v61  ;;  %v2417_v61 = vld [vmem:[#allocation7 + $0x16c] ss:$16 sps:$4 sm:$0xff]   ;;  %745 = vmatpush1.bf16.msra.mxu0 %v2419_v62 }
  0xef   :  { %v3176_v10 = vsub.f32 %v3125_v2, %v152_v63  ;;  %v3179_v11 = vsub.f32 %v3129_v4, %v152_v63  ;;  %v130_v18 = vpop.xlane.xlu0 %129  ;;  %v2420_v63 = vld [vmem:[#allocation7 + $0x168] ss:$16 sps:$4 sm:$0xff]   ;;  %817 = vmatprep.subr.bf16.mxu1 %v2417_v61 }
  0xf0   :  { %v151_v21 = vmul.f32 0.00390625, %v130_v18  ;;  %v136_v22 = vpop.xlane.xlu1 %135  ;;  %v174_v23 = vmul.f32 %v3170_v3, %v3170_v3  ;;  %v175_v24 = vmul.f32 %v3173_v7, %v3173_v7  ;;  %818 = vmatpush1.bf16.msra.mxu1 %v2420_v63  ;;  %v2421_v18 = vld [vmem:[#allocation7 + $0x184] ss:$16 sps:$4 sm:$0xff]  }
  0xf1   :  { %v153_v0 = vmul.f32 0.00390625, %v136_v22  ;;  %v178_v1 = vmul.f32 %v3176_v10, %v3176_v10  ;;  %v179_v2 = vmul.f32 %v3179_v11, %v3179_v11  ;;  %v2425_v22 = vld [vmem:[#allocation7 + $0x180] ss:$16 sps:$4 sm:$0xff]   ;;  %746 = vmatprep.subr.bf16.mxu0 %v2421_v18 }
  0xf2   :  { %v3190_v25 = vsub.f32 %v3131_v5, %v151_v21  ;;  %v3193_v4 = vsub.f32 %v3133_v6, %v151_v21  ;;  %v190_v26 = vadd.f32 %v175_v24, %v174_v23  ;;  %v2423_v21 = vld [vmem:[#allocation7 + $0x18c] ss:$16 sps:$4 sm:$0xff]   ;;  %v2426_v23 = vld [vmem:[#allocation7 + $0x188] ss:$16 sps:$4 sm:$0xff]   ;;  %747 = vmatpush1.bf16.msra.mxu0 %v2425_v22  ;;  %v2427_v24 = vld [vmem:[#allocation7 + $0x1a4] ss:$16 sps:$4 sm:$0xff]  }
  0xf3   :  { %v3196_v27 = vsub.f32 %v3137_v8, %v153_v0  ;;  %v3199_v28 = vsub.f32 %v3139_v9, %v153_v0  ;;  %v139_v29 = vpop.xlane.xlu0 %138  ;;  %v196_v32 = vadd.f32 %v179_v2, %v178_v1  ;;  %819 = vmatprep.subr.bf16.mxu1 %v2423_v21  ;;  %v2429_v0 = vld [vmem:[#allocation7 + $0x1ac] ss:$16 sps:$4 sm:$0xff]   ;;  %v2431_v1 = vld [vmem:[#allocation7 + $0x1a0] ss:$16 sps:$4 sm:$0xff]   ;;  %v2432_v2 = vld [vmem:[#allocation7 + $0x1a8] ss:$16 sps:$4 sm:$0xff]   ;;  %748 = vmatprep.subr.bf16.mxu0 %v2427_v24 }
  0xf4   :  { %v154_v30 = vmul.f32 0.00390625, %v139_v29  ;;  %191 = vadd.xlane.f32.xlu0 %v190_v26  ;;  %v142_v31 = vpop.xlane.xlu1 %141  ;;  %v176_v33 = vmul.f32 %v3190_v25, %v3190_v25  ;;  %v177_v5 = vmul.f32 %v3193_v4, %v3193_v4  ;;  %820 = vmatpush1.bf16.msra.mxu1 %v2426_v23  ;;  %v2433_v26 = vld [vmem:[#allocation7 + $0x1c4] ss:$16 sps:$4 sm:$0xff]   ;;  %v2435_v29 = vld [vmem:[#allocation7 + $0x1cc] ss:$16 sps:$4 sm:$0xff]  }
  0xf5   :  { %v155_v6 = vmul.f32 0.00390625, %v142_v31  ;;  %v180_v34 = vmul.f32 %v3196_v27, %v3196_v27  ;;  %v181_v8 = vmul.f32 %v3199_v28, %v3199_v28  ;;  %821 = vmatprep.subr.bf16.mxu1 %v2429_v0  ;;  %v2438_v31 = vld [vmem:[#allocation7 + $0x1c8] ss:$16 sps:$4 sm:$0xff]  }
  0xf6   :  { %v3210_v9 = vsub.f32 %v3145_v12, %v154_v30  ;;  %v3213_v35 = vsub.f32 %v3147_v13, %v154_v30  ;;  %v193_v36 = vadd.f32 %v177_v5, %v176_v33  ;;  %749 = vmatpush1.bf16.msra.mxu0 %v2431_v1  ;;  %v2437_v30 = vld [vmem:[#allocation7 + $0x1c0] ss:$16 sps:$4 sm:$0xff]   ;;  %v2441_v33 = vld [vmem:[#allocation7 + $0x1ec] ss:$16 sps:$4 sm:$0xff]  }
  0xf7   :  { %v3216_v37 = vsub.f32 %v3149_v14, %v155_v6  ;;  %v3219_v38 = vsub.f32 %v3151_v15, %v155_v6  ;;  %v145_v39 = vpop.xlane.xlu0 %144  ;;  %v199_v42 = vadd.f32 %v181_v8, %v180_v34  ;;  %750 = vmatprep.subr.bf16.mxu0 %v2433_v26  ;;  %v2443_v5 = vld [vmem:[#allocation7 + $0x1e0] ss:$16 sps:$4 sm:$0xff]   ;;  %v2444_v6 = vld [vmem:[#allocation7 + $0x1e8] ss:$16 sps:$4 sm:$0xff]   ;;  %v2447_v34 = vld [vmem:[#allocation8 + $0x4] ss:$8 sps:$4 sm:$0xff]  }
  0xf8   :  { %v156_v40 = vmul.f32 0.00390625, %v145_v39  ;;  %197 = vadd.xlane.f32.xlu0 %v196_v32  ;;  %194 = vadd.xlane.f32.xlu1 %v193_v36  ;;  %v148_v41 = vpop.xlane.xlu1 %147  ;;  %v182_v12 = vmul.f32 %v3210_v9, %v3210_v9  ;;  %v183_v13 = vmul.f32 %v3213_v35, %v3213_v35  ;;  %v2439_v32 = vld [vmem:[#allocation7 + $0x1e4] ss:$16 sps:$4 sm:$0xff]  }
  0xf9   :  { %v157_v43 = vmul.f32 0.00390625, %v148_v41  ;;  %v184_v14 = vmul.f32 %v3216_v37, %v3216_v37  ;;  %v185_v15 = vmul.f32 %v3219_v38, %v3219_v38  ;;  %822 = vmatpush1.bf16.msra.mxu1 %v2432_v2 }
  0xfa   :  { %v3230_v44 = vsub.f32 %v3153_v16, %v156_v40  ;;  %v3233_v45 = vsub.f32 %v3155_v17, %v156_v40  ;;  %v202_v46 = vadd.f32 %v183_v13, %v182_v12  ;;  %823 = vmatprep.subr.bf16.mxu1 %v2435_v29  ;;  %751 = vmatpush1.bf16.msra.mxu0 %v2437_v30  ;;  %v255_v40 = vlaneseq }
  0xfb   :  { %v3236_v47 = vsub.f32 %v3159_v19, %v157_v43  ;;  %v3239_v48 = vsub.f32 %v3161_v20, %v157_v43  ;;  %v205_v49 = vadd.f32 %v185_v15, %v184_v14  ;;  %752 = vmatprep.subr.bf16.mxu0 %v2439_v32 }
  0xfc   :  { %200 = vadd.xlane.f32.xlu1 %v199_v42  ;;  %203 = vadd.xlane.f32.xlu0 %v202_v46  ;;  %v186_v50 = vmul.f32 %v3230_v44, %v3230_v44  ;;  %v187_v16 = vmul.f32 %v3233_v45, %v3233_v45  ;;  %v3249_v15 = vshrl.u32 %v255_v40, 7 }
  0xfd   :  { %v188_v17 = vmul.f32 %v3236_v47, %v3236_v47  ;;  %v189_v51 = vmul.f32 %v3239_v48, %v3239_v48  ;;  %824 = vmatpush1.bf16.msra.mxu1 %v2438_v31 }
  0xfe   :  { %v208_v19 = vadd.f32 %v187_v16, %v186_v50  ;;  %825 = vmatprep.subr.bf16.mxu1 %v2441_v33  ;;  %753 = vmatpush1.bf16.msra.mxu0 %v2443_v5 }
  0xff   :  { %v211_v20 = vadd.f32 %v189_v51, %v188_v17  ;;  %1632 = vmatprep.subr.bf16.mxu0 %v2447_v34 }
 0x100   :  { %206 = vadd.xlane.f32.xlu1 %v205_v49  ;;  %209 = vadd.xlane.f32.xlu0 %v208_v19  ;;  %v3252_v19 = vsub.s32 0, %v3249_v15 }
 0x101   :  { %826 = vmatpush1.bf16.msra.mxu1 %v2444_v6 }
 0x102   :  { %3773 = vst [vmem:[#allocation19_spill] sm:$0xff] %v3252_v19  ;;  %v3264_v60 = vrot.slane %v123_v54, %v3252_v19  ;;  %v3272_v23 = vrot.slane %v124_v59, %v3252_v19 }
 0x104   :  { %212 = vadd.xlane.f32.xlu1 %v211_v20  ;;  %v3255_v20 = vsub.s32 1, %v3249_v15 }
 0x106   :  { %3774 = vst [vmem:[#allocation20_spill] sm:$0xff] %v3255_v20  ;;  %v3267_v61 = vrot.slane %v123_v54, %v3255_v20  ;;  %v3276_v2 = vrot.slane %v124_v59, %v3255_v20 }
 0x181   :  { %v192_v8 = vpop.xlane.xlu0 %191 }
 0x182   :  { %v214_v36 = vmul.f32 0.00390625, %v192_v8 }
 0x184   :  { %v222_v39 = vadd.f32 1e-05, %v214_v36 }
 0x185   :  { %v195_v41 = vpop.xlane.xlu1 %194  ;;  %v198_v42 = vpop.xlane.xlu0 %197 }
 0x186   :  { %2589 = vrsqrt.f32 %v222_v39  ;;  %v215_v12 = vmul.f32 0.00390625, %v195_v41  ;;  %v216_v13 = vmul.f32 0.00390625, %v198_v42 }
 0x188   :  { %v223_v43 = vadd.f32 1e-05, %v215_v12  ;;  %v224_v14 = vadd.f32 1e-05, %v216_v13  ;;  %v2445_v13 = vld [vmem:[#allocation8] ss:$8 sps:$4 sm:$0xff]  }
 0x189   :  { %v201_v46 = vpop.xlane.xlu1 %200  ;;  %v204_v49 = vpop.xlane.xlu0 %203 }
 0x18a   :  { %2591 = vrsqrt.f32 %v223_v43  ;;  %v217_v50 = vmul.f32 0.00390625, %v201_v46  ;;  %v218_v16 = vmul.f32 0.00390625, %v204_v49  ;;  %v2450_v46 = vld [vmem:[#allocation8 + $0x14] ss:$8 sps:$4 sm:$0xff]  }
 0x18b   :  { %2593 = vrsqrt.f32 %v224_v14 }
 0x18c   :  { %v225_v17 = vadd.f32 1e-05, %v217_v50  ;;  %v226_v51 = vadd.f32 1e-05, %v218_v16 }
 0x18d   :  { %v207_v52 = vpop.xlane.xlu1 %206  ;;  %v210_v53 = vpop.xlane.xlu0 %209 }
 0x18e   :  { %2595 = vrsqrt.f32 %v225_v17  ;;  %v219_v55 = vmul.f32 0.00390625, %v207_v52  ;;  %v220_v56 = vmul.f32 0.00390625, %v210_v53 }
 0x18f   :  { %2597 = vrsqrt.f32 %v226_v51  ;;  %v2448_v51 = vld [vmem:[#allocation8 + $0x10] ss:$8 sps:$4 sm:$0xff]  }
 0x190   :  { %v2590_v57 = vpop.eup %2589  ;;  %v227_v58 = vadd.f32 1e-05, %v219_v55  ;;  %v228_v62 = vadd.f32 1e-05, %v220_v56  ;;  %v2453_v55 = vld [vmem:[#allocation8 + $0x24] ss:$8 sps:$4 sm:$0xff]  }
 0x191   :  { %v213_v63 = vpop.xlane.xlu1 %212  ;;  %v239_v18 = vmul.f32 %v2590_v57, %v3173_v7  ;;  %v238_v21 = vmul.f32 %v2590_v57, %v3170_v3 }
 0x192   :  { %2599 = vrsqrt.f32 %v227_v58  ;;  %v221_v22 = vmul.f32 0.00390625, %v213_v63 }
 0x193   :  { %v266_v1 = vmul.f32 %v3267_v61, %v239_v18  ;;  %v265_v26 = vmul.f32 %v3264_v60, %v238_v21  ;;  %2601 = vrsqrt.f32 %v228_v62  ;;  %v2451_v18 = vld [vmem:[#allocation8 + $0x20] ss:$8 sps:$4 sm:$0xff]  }
 0x194   :  { %v2592_v24 = vpop.eup %2591  ;;  %v229_v0 = vadd.f32 1e-05, %v221_v22 }
 0x195   :  { %v2594_v29 = vpop.eup %2593  ;;  %v241_v7 = vmul.f32 %v2592_v24, %v3193_v4  ;;  %v240_v3 = vmul.f32 %v2592_v24, %v3190_v25  ;;  %v293_v5 = vadd.f32 %v3276_v2, %v266_v1  ;;  %v292_v6 = vadd.f32 %v3272_v23, %v265_v26 }
 0x196   :  { %2603 = vrsqrt.f32 %v229_v0  ;;  %v243_v30 = vmul.f32 %v2594_v29, %v3179_v11  ;;  %v242_v39 = vmul.f32 %v2594_v29, %v3176_v10 }
 0x197   :  { %v268_v31 = vmul.f32 %v3267_v61, %v241_v7  ;;  %v267_v32 = vmul.f32 %v3264_v60, %v240_v3 }
 0x198   :  { %v2596_v33 = vpop.eup %2595  ;;  %v270_v34 = vmul.f32 %v3267_v61, %v243_v30  ;;  %v269_v10 = vmul.f32 %v3264_v60, %v242_v39  ;;  %v2472_v39 = vld [vmem:[#allocation8 + $0x90] ss:$8 sps:$4 sm:$0xff]  }
 0x199   :  { %v2598_v8 = vpop.eup %2597  ;;  %v295_v36 = vadd.f32 %v3276_v2, %v268_v31  ;;  %v294_v4 = vadd.f32 %v3272_v23, %v267_v32  ;;  %v245_v25 = vmul.f32 %v2596_v33, %v3199_v28  ;;  %v244_v11 = vmul.f32 %v2596_v33, %v3196_v27  ;;  %v2454_v33 = vld [vmem:[#allocation8 + $0x30] ss:$8 sps:$4 sm:$0xff]  }
 0x19a   :  { %v247_v12 = vmul.f32 %v2598_v8, %v3213_v35  ;;  %v297_v49 = vadd.f32 %v3276_v2, %v270_v34  ;;  %v296_v57 = vadd.f32 %v3272_v23, %v269_v10  ;;  %v246_v58 = vmul.f32 %v2598_v8, %v3210_v9  ;;  %v2460_v34 = vld [vmem:[#allocation8 + $0x50] ss:$8 sps:$4 sm:$0xff]   ;;  %v2463_v8 = vld [vmem:[#allocation8 + $0x60] ss:$8 sps:$4 sm:$0xff]  }
 0x19b   :  { %v309_v40 = vpack.c.bf16 %v295_v36, %v293_v5  ;;  %v308_v41 = vpack.c.bf16 %v294_v4, %v292_v6  ;;  %v272_v42 = vmul.f32 %v3267_v61, %v245_v25  ;;  %v271_v14 = vmul.f32 %v3264_v60, %v244_v11  ;;  %v2457_v5 = vld [vmem:[#allocation8 + $0x40] ss:$8 sps:$4 sm:$0xff]   ;;  %v2462_v6 = vld [vmem:[#allocation8 + $0x54] ss:$8 sps:$4 sm:$0xff]   ;;  %v2466_v36 = vld [vmem:[#allocation8 + $0x70] ss:$8 sps:$4 sm:$0xff]  }
 0x19c   :  { %v2600_v43 = vpop.eup %2599  ;;  %v274_v35 = vmul.f32 %v3267_v61, %v247_v12  ;;  %v2471_v4 = vld [vmem:[#allocation8 + $0x84] ss:$8 sps:$4 sm:$0xff]   ;;  %v2469_v25 = vld [vmem:[#allocation8 + $0x80] ss:$8 sps:$4 sm:$0xff]   ;;  %v2474_v11 = vld [vmem:[#allocation8 + $0x94] ss:$8 sps:$4 sm:$0xff]  }
 0x19d   :  { %754 = vmatprep.mubr.bf16.mxu0 %v309_v40  ;;  %827 = vmatprep.mubr.bf16.mxu1 %v309_v40  ;;  %v299_v28 = vadd.f32 %v3276_v2, %v272_v42  ;;  %v249_v27 = vmul.f32 %v2600_v43, %v3219_v38  ;;  %v2602_v50 = vpop.eup %2601  ;;  %v298_v53 = vadd.f32 %v3272_v23, %v271_v14  ;;  %v2477_v40 = vld [vmem:[#allocation8 + $0xa4] ss:$8 sps:$4 sm:$0xff]   ;;  %v2480_v42 = vld [vmem:[#allocation8 + $0xb4] ss:$8 sps:$4 sm:$0xff]   ;;  %v2478_v12 = vld [vmem:[#allocation8 + $0xb0] ss:$8 sps:$4 sm:$0xff]  }
 0x19e   :  { %755 = vmatmul.mubr.bf16.vlgmr.msra.gmra.mrb[0].mxu0 %v308_v41  ;;  %828 = vmatmul.mubr.bf16.vlgmr.msra.gmra.mrb[0].mxu1 %v308_v41  ;;  %v248_v54 = vmul.f32 %v2600_v43, %v3216_v37  ;;  %v301_v59 = vadd.f32 %v3276_v2, %v274_v35  ;;  %v251_v62 = vmul.f32 %v2602_v50, %v3233_v45  ;;  %v2475_v41 = vld [vmem:[#allocation8 + $0xa0] ss:$8 sps:$4 sm:$0xff]   ;;  %v2486_v14 = vld [vmem:[#allocation8 + $0xd4] ss:$8 sps:$4 sm:$0xff]   ;;  %v2490_v10 = vld [vmem:[#allocation8 + $0xf0] ss:$8 sps:$4 sm:$0xff]  }
 0x19f   :  { %v311_v16 = vpack.c.bf16 %v299_v28, %v297_v49  ;;  %v276_v17 = vmul.f32 %v3267_v61, %v249_v27  ;;  %1633 = vmatpush1.bf16.msra.mxu0 %v2445_v13  ;;  %v310_v63 = vpack.c.bf16 %v298_v53, %v296_v57  ;;  %v250_v26 = vmul.f32 %v2602_v50, %v3230_v44  ;;  %v2456_v44 = vld [vmem:[#allocation8 + $0x34] ss:$8 sps:$4 sm:$0xff]   ;;  %v2483_v13 = vld [vmem:[#allocation8 + $0xc4] ss:$8 sps:$4 sm:$0xff]   ;;  %v2481_v43 = vld [vmem:[#allocation8 + $0xc0] ss:$8 sps:$4 sm:$0xff]  }
 0x1a0   :  { %v2604_v52 = vpop.eup %2603  ;;  %1634 = vmatprep.subr.bf16.mxu0 %v2450_v46  ;;  %v275_v37 = vmul.f32 %v3264_v60, %v248_v54  ;;  %v278_v9 = vmul.f32 %v3267_v61, %v251_v62  ;;  %v2484_v46 = vld [vmem:[#allocation8 + $0xd0] ss:$8 sps:$4 sm:$0xff]   ;;  %v2489_v49 = vld [vmem:[#allocation8 + $0xe4] ss:$8 sps:$4 sm:$0xff]   ;;  %v2487_v28 = vld [vmem:[#allocation8 + $0xe0] ss:$8 sps:$4 sm:$0xff]  }
 0x1a1   :  { %764 = vmatprep.mubr.bf16.mxu0 %v311_v16  ;;  %837 = vmatprep.mubr.bf16.mxu1 %v311_v16  ;;  %v303_v38 = vadd.f32 %v3276_v2, %v276_v17  ;;  %v253_v56 = vmul.f32 %v2604_v52, %v3239_v48  ;;  %v273_v48 = vmul.f32 %v3264_v60, %v246_v58  ;;  %v2492_v27 = vld [vmem:[#allocation8 + $0xf4] ss:$8 sps:$4 sm:$0xff]   ;;  %v2495_v50 = vld [vmem:[#allocation10 + $0x4] ss:$8 sps:$4 sm:$0xff]   ;;  %v2493_v16 = vld [vmem:[#allocation10] ss:$8 sps:$4 sm:$0xff]  }
 0x1a2   :  { %v302_v24 = vadd.f32 %v3272_v23, %v275_v37  ;;  %v252_v45 = vmul.f32 %v2604_v52, %v3236_v47  ;;  %v305_v29 = vadd.f32 %v3276_v2, %v278_v9  ;;  %2022 = vmatprep.subr.bf16.mxu1 %v2495_v50  ;;  %v2498_v35 = vld [vmem:[#allocation8 + $0x104] ss:$8 sps:$4 sm:$0xff]   ;;  %v2501_v17 = vld [vmem:[#allocation10 + $0x14] ss:$8 sps:$4 sm:$0xff]   ;;  %v392_v52 = vsub.s32 2, %v3249_v15 }
 0x1a3   :  { %1635 = vmatpush1.bf16.msra.mxu0 %v2448_v51  ;;  %v313_v21 = vpack.c.bf16 %v303_v38, %v301_v59  ;;  %v280_v22 = vmul.f32 %v3267_v61, %v253_v56  ;;  %v300_v1 = vadd.f32 %v3272_v23, %v273_v48  ;;  %v277_v61 = vmul.f32 %v3264_v60, %v250_v26  ;;  %v2499_v51 = vld [vmem:[#allocation10 + $0x10] ss:$8 sps:$4 sm:$0xff]   ;;  %v380_v53 = vld [vmem:[%s3762_s5] sm:$0xf]  ;;  %v2513_v62 = vld [vmem:[#allocation10 + $0x34] ss:$8 sps:$4 sm:$0xff]  }
 0x1a4   :  { %1636 = vmatprep.subr.bf16.mxu0 %v2453_v55  ;;  %v279_v3 = vmul.f32 %v3264_v60, %v252_v45  ;;  %v2465_v60 = vld [vmem:[#allocation8 + $0x64] ss:$8 sps:$4 sm:$0xff]   ;;  %2023 = vmatpush1.bf16.msra.mxu1 %v2493_v16  ;;  %v396_v54 = vsub.s32 3, %v3249_v15  ;;  %v2505_v38 = vld [vmem:[#allocation10 + $0x20] ss:$8 sps:$4 sm:$0xff]   ;;  %v3329_v56 = vrot.slane %v380_v53, %v3252_v19  ;;  %v3331_v57 = vrot.slane %v380_v53, %v392_v52 }
 0x1a5   :  { %v307_v0 = vadd.f32 %v3276_v2, %v280_v22  ;;  %v312_v7 = vpack.c.bf16 %v302_v24, %v300_v1  ;;  %v304_v31 = vadd.f32 %v3272_v23, %v277_v61  ;;  %v2459_v2 = vld [vmem:[#allocation8 + $0x44] ss:$8 sps:$4 sm:$0xff]   ;;  %2024 = vmatprep.subr.bf16.mxu1 %v2501_v17  ;;  %v3334_v58 = vrot.slane %v380_v53, %v3255_v20 }
 0x1a6   :  { %765 = vmatmul.mubr.bf16.gmra.mrb[4].mxu0 %v310_v63  ;;  %838 = vmatmul.mubr.bf16.gmra.mrb[4].mxu1 %v310_v63  ;;  %v306_v47 = vadd.f32 %v3272_v23, %v279_v3  ;;  %v2468_v23 = vld [vmem:[#allocation8 + $0x74] ss:$8 sps:$4 sm:$0xff]   ;;  %v2507_v55 = vld [vmem:[#allocation10 + $0x24] ss:$8 sps:$4 sm:$0xff]   ;;  %v3336_v59 = vrot.slane %v380_v53, %v396_v54  ;;  %v2511_v63 = vld [vmem:[#allocation10 + $0x30] ss:$8 sps:$4 sm:$0xff]  }
 0x1a7   :  { %774 = vmatprep.mubr.bf16.mxu0 %v313_v21  ;;  %847 = vmatprep.mubr.bf16.mxu1 %v313_v21  ;;  %v315_v30 = vpack.c.bf16 %v307_v0, %v305_v29  ;;  %v2519_v1 = vld [vmem:[#allocation10 + $0x44] ss:$8 sps:$4 sm:$0xff]  }
 0x1a8   :  { %1637 = vmatpush1.bf16.msra.mxu0 %v2451_v18  ;;  %v314_v32 = vpack.c.bf16 %v306_v47, %v304_v31  ;;  %2025 = vmatpush1.bf16.msra.mxu1 %v2499_v51 }
 0x1a9   :  { %1638 = vmatprep.subr.bf16.mxu0 %v2456_v44  ;;  %2026 = vmatprep.subr.bf16.mxu1 %v2507_v55 }
 0x1ac   :  { %1639 = vmatpush1.bf16.msra.mxu0 %v2454_v33  ;;  %2027 = vmatpush1.bf16.msra.mxu1 %v2505_v38  ;;  %v2517_v33 = vld [vmem:[#allocation10 + $0x40] ss:$8 sps:$4 sm:$0xff]  }
 0x1ad   :  { %1640 = vmatprep.subr.bf16.mxu0 %v2459_v2  ;;  %2028 = vmatprep.subr.bf16.mxu1 %v2513_v62  ;;  %v2523_v62 = vld [vmem:[#allocation10 + $0x50] ss:$8 sps:$4 sm:$0xff]  }
 0x1ae   :  { %775 = vmatmul.mubr.bf16.gmra.mrb[8].mxu0 %v312_v7  ;;  %848 = vmatmul.mubr.bf16.gmra.mrb[8].mxu1 %v312_v7 }
 0x1af   :  { %784 = vmatprep.mubr.bf16.mxu0 %v315_v30  ;;  %857 = vmatprep.mubr.bf16.mxu1 %v315_v30 }
 0x1b0   :  { %1641 = vmatpush1.bf16.msra.mxu0 %v2457_v5  ;;  %2029 = vmatpush1.bf16.msra.mxu1 %v2511_v63 }
 0x1b1   :  { %1642 = vmatprep.subr.bf16.mxu0 %v2462_v6  ;;  %2030 = vmatprep.subr.bf16.mxu1 %v2519_v1 }
 0x1b4   :  { %1643 = vmatpush1.bf16.msra.mxu0 %v2460_v34  ;;  %2031 = vmatpush1.bf16.msra.mxu1 %v2517_v33 }
 0x1b5   :  { %1644 = vmatprep.subr.bf16.mxu0 %v2465_v60 }
 0x1b6   :  { %785 = vmatmul.mubr.bf16.gmra.mrb[12].mxu0 %v314_v32  ;;  %858 = vmatmul.mubr.bf16.gmra.mrb[12].mxu1 %v314_v32 }
 0x1b8   :  { %1645 = vmatpush1.bf16.msra.mxu0 %v2463_v8 }
 0x1b9   :  { %1646 = vmatprep.subr.bf16.mxu0 %v2468_v23 }
 0x1bc   :  { %1647 = vmatpush1.bf16.msra.mxu0 %v2466_v36 }
 0x1bd   :  { %1648 = vmatprep.subr.bf16.mxu0 %v2471_v4 }
 0x1c0   :  { %1649 = vmatpush1.bf16.msra.mxu0 %v2469_v25 }
 0x1c1   :  { %1650 = vmatprep.subr.bf16.mxu0 %v2474_v11 }
 0x1c4   :  { %1651 = vmatpush1.bf16.msra.mxu0 %v2472_v39 }
 0x1c5   :  { %1652 = vmatprep.subr.bf16.mxu0 %v2477_v40 }
 0x1c8   :  { %1653 = vmatpush1.bf16.msra.mxu0 %v2475_v41 }
 0x1c9   :  { %1654 = vmatprep.subr.bf16.mxu0 %v2480_v42 }
 0x1cc   :  { %1655 = vmatpush1.bf16.msra.mxu0 %v2478_v12 }
 0x1cd   :  { %1656 = vmatprep.subr.bf16.mxu0 %v2483_v13 }
 0x1d0   :  { %1657 = vmatpush1.bf16.msra.mxu0 %v2481_v43 }
 0x1d1   :  { %1658 = vmatprep.subr.bf16.mxu0 %v2486_v14 }
 0x1d4   :  { %1659 = vmatpush1.bf16.msra.mxu0 %v2484_v46 }
 0x1d5   :  { %1660 = vmatprep.subr.bf16.mxu0 %v2489_v49 }
 0x1d8   :  { %1661 = vmatpush1.bf16.msra.mxu0 %v2487_v28 }
 0x1d9   :  { %1662 = vmatprep.subr.bf16.mxu0 %v2492_v27 }
 0x1dc   :  { %1663 = vmatpush1.bf16.msra.mxu0 %v2490_v10 }
 0x1dd   :  { %1705 = vmatprep.subr.bf16.mxu0 %v2498_v35 }
 0x271   :  { %v756_v37 = vpop.f32.mrb[0].mxu0  ;;  %v829_v18 = vpop.f32.mrb[0].mxu1 }
 0x272   :  { %v3339_v15 = vadd.f32 %v756_v37, %v3329_v56  ;;  %v3342_v21 = vadd.f32 %v829_v18, %v3331_v57  ;;  %v758_v22 = vpop.f32.mrb[1].mxu0  ;;  %v831_v48 = vpop.f32.mrb[1].mxu1 }
 0x273   :  { %v3345_v9 = vadd.f32 %v758_v22, %v3334_v58  ;;  %v3348_v24 = vadd.f32 %v831_v48, %v3336_v59  ;;  %v760_v45 = vpop.f32.mrb[2].mxu0  ;;  %v833_v0 = vpop.f32.mrb[2].mxu1 }
 0x274   :  { %v868_v26 = vand.u32 2147483647, %v3339_v15  ;;  %v870_v29 = vand.u32 2147483647, %v3342_v21  ;;  %v3355_v47 = vadd.f32 %v760_v45, %v3329_v56  ;;  %v3358_v31 = vadd.f32 %v833_v0, %v3331_v57  ;;  %v762_v32 = vpop.f32.mrb[3].mxu0  ;;  %v835_v44 = vpop.f32.mrb[3].mxu1 }
 0x275   :  { %v869_v7 = vand.u32 2147483647, %v3345_v9  ;;  %v871_v3 = vand.u32 2147483647, %v3348_v24  ;;  %v3361_v6 = vadd.f32 %v762_v32, %v3334_v58  ;;  %v3364_v34 = vadd.f32 %v835_v44, %v3336_v59  ;;  %v2525_v45 = vld [vmem:[#allocation10 + $0x54] ss:$8 sps:$4 sm:$0xff]  }
 0x276   :  { %v900_v30 = vsub.f32 0.0, %v868_v26  ;;  %v902_v61 = vsub.f32 0.0, %v870_v29  ;;  %v872_v23 = vand.u32 2147483647, %v3355_v47  ;;  %v874_v11 = vand.u32 2147483647, %v3358_v31  ;;  %2032 = vmatprep.subr.bf16.mxu1 %v2525_v45 }
 0x277   :  { %v901_v2 = vsub.f32 0.0, %v869_v7  ;;  %v903_v5 = vsub.f32 0.0, %v871_v3  ;;  %v873_v39 = vand.u32 2147483647, %v3361_v6  ;;  %v875_v41 = vand.u32 2147483647, %v3364_v34  ;;  %2033 = vmatpush1.bf16.msra.mxu1 %v2523_v62 }
 0x278   :  { %v932_v60 = vmul.f32 1.442695, %v900_v30  ;;  %v936_v8 = vmul.f32 1.442695, %v902_v61  ;;  %v904_v25 = vsub.f32 0.0, %v872_v23  ;;  %v906_v43 = vsub.f32 0.0, %v874_v11 }
 0x279   :  { %v934_v36 = vmul.f32 1.442695, %v901_v2  ;;  %v938_v4 = vmul.f32 1.442695, %v903_v5  ;;  %v766_v40 = vpop.f32.mrb[4].mxu0  ;;  %v839_v42 = vpop.f32.mrb[4].mxu1 }
 0x27a   :  { %2605 = vpow2.f32 %v932_v60  ;;  %v768_v12 = vpop.f32.mrb[5].mxu0  ;;  %v940_v13 = vmul.f32 1.442695, %v904_v25  ;;  %v905_v14 = vsub.f32 0.0, %v873_v39  ;;  %v841_v46 = vpop.f32.mrb[5].mxu1  ;;  %v907_v28 = vsub.f32 0.0, %v875_v41 }
 0x27b   :  { %2607 = vpow2.f32 %v936_v8  ;;  %v770_v49 = vpop.f32.mrb[6].mxu0  ;;  %v3371_v27 = vadd.f32 %v766_v40, %v3329_v56  ;;  %v3374_v10 = vadd.f32 %v839_v42, %v3331_v57  ;;  %v843_v50 = vpop.f32.mrb[6].mxu1  ;;  %v944_v35 = vmul.f32 1.442695, %v906_v43  ;;  %v2529_v62 = vld [vmem:[#allocation10 + $0x60] ss:$8 sps:$4 sm:$0xff]  }
 0x27c   :  { %2609 = vpow2.f32 %v934_v36  ;;  %v772_v16 = vpop.f32.mrb[7].mxu0  ;;  %v942_v17 = vmul.f32 1.442695, %v905_v14  ;;  %v3377_v51 = vadd.f32 %v768_v12, %v3334_v58  ;;  %v3379_v52 = vpop.f32.mrb[7].mxu1  ;;  %v946_v53 = vmul.f32 1.442695, %v907_v28 }
 0x27d   :  { %2611 = vpow2.f32 %v938_v4  ;;  %v876_v54 = vand.u32 2147483647, %v3371_v27  ;;  %v878_v55 = vand.u32 2147483647, %v3374_v10  ;;  %v3385_v37 = vadd.f32 %v841_v46, %v3336_v59 }
 0x27e   :  { %2613 = vpow2.f32 %v940_v13  ;;  %v877_v38 = vand.u32 2147483647, %v3377_v51  ;;  %v3388_v18 = vadd.f32 %v770_v49, %v3329_v56  ;;  %v3399_v7 = vadd.f32 %v843_v50, %v3331_v57 }
 0x27f   :  { %2615 = vpow2.f32 %v944_v35  ;;  %v908_v63 = vsub.f32 0.0, %v876_v54  ;;  %v910_v0 = vsub.f32 0.0, %v878_v55  ;;  %v879_v32 = vand.u32 2147483647, %v3385_v37 }
 0x280   :  { %2617 = vpow2.f32 %v942_v17  ;;  %v909_v61 = vsub.f32 0.0, %v877_v38  ;;  %v880_v2 = vand.u32 2147483647, %v3388_v18  ;;  %v3404_v5 = vadd.f32 %v772_v16, %v3334_v58 }
 0x281   :  { %v3390_v22 = vpop.f32.mrb[8].mxu0  ;;  %v3392_v48 = vpop.f32.mrb[8].mxu1  ;;  %2619 = vpow2.f32 %v946_v53  ;;  %v948_v29 = vmul.f32 1.442695, %v908_v63  ;;  %v952_v30 = vmul.f32 1.442695, %v910_v0 }
 0x282   :  { %v3394_v1 = vpop.f32.mrb[9].mxu0  ;;  %v3396_v26 = vpop.f32.mrb[9].mxu1  ;;  %v1092_v36 = vmax.f32 %v3339_v15, 0.0  ;;  %v1094_v25 = vmax.f32 %v3342_v21, 0.0  ;;  %v1093_v42 = vmax.f32 %v3345_v9, 0.0  ;;  %v911_v46 = vsub.f32 0.0, %v879_v32 }
 0x283   :  { %2621 = vpow2.f32 %v948_v29  ;;  %v3406_v60 = vpop.f32.mrb[10].mxu0  ;;  %v3408_v8 = vpop.f32.mrb[10].mxu1  ;;  %v882_v12 = vand.u32 2147483647, %v3399_v7  ;;  %v950_v14 = vmul.f32 1.442695, %v909_v61 }
 0x284   :  { %v2606_v3 = vpop.eup %2605  ;;  %2623 = vpow2.f32 %v952_v30  ;;  %v3412_v11 = vpop.f32.mrb[11].mxu0  ;;  %v912_v28 = vsub.f32 0.0, %v880_v2  ;;  %v881_v50 = vand.u32 2147483647, %v3404_v5  ;;  %v1095_v53 = vmax.f32 %v3348_v24, 0.0 }
 0x285   :  { %v2608_v44 = vpop.eup %2607  ;;  %v996_v33 = vadd.f32 1.0, %v2606_v3  ;;  %v3414_v39 = vpop.f32.mrb[11].mxu1  ;;  %v1096_v54 = vmax.f32 %v3355_v47, 0.0  ;;  %v914_v0 = vsub.f32 0.0, %v882_v12  ;;  %v2531_v30 = vld [vmem:[#allocation10 + $0x64] ss:$8 sps:$4 sm:$0xff]  }
 0x286   :  { %v2610_v23 = vpop.eup %2609  ;;  %v998_v4 = vadd.f32 1.0, %v2608_v44  ;;  %v954_v44 = vmul.f32 1.442695, %v911_v46  ;;  %2034 = vmatprep.subr.bf16.mxu1 %v2531_v30  ;;  %v1098_v12 = vmax.f32 %v3358_v31, 0.0  ;;  %v1106_v20 = vmax.f32 %v3399_v7, 0.0 }
 0x287   :  { %v2612_v40 = vpop.eup %2611  ;;  %2625 = vlog2.f32 %v996_v33  ;;  %v997_v41 = vadd.f32 1.0, %v2610_v23  ;;  %v3435_v33 = vadd.f32 %v3379_v52, %v3336_v59  ;;  %2035 = vmatpush1.bf16.msra.mxu1 %v2529_v62  ;;  %v960_v46 = vmul.f32 1.442695, %v914_v0 }
 0x288   :  { %v2614_v13 = vpop.eup %2613  ;;  %2627 = vlog2.f32 %v998_v4  ;;  %v999_v43 = vadd.f32 1.0, %v2612_v40  ;;  %v956_v4 = vmul.f32 1.442695, %v912_v28  ;;  %v913_v40 = vsub.f32 0.0, %v881_v50 }
 0x289   :  { %2629 = vlog2.f32 %v997_v41  ;;  %v1000_v49 = vadd.f32 1.0, %v2614_v13  ;;  %v3419_v16 = vpop.f32.mrb[12].mxu0  ;;  %v3421_v35 = vpop.f32.mrb[12].mxu1  ;;  %v1097_v13 = vmax.f32 %v3361_v6, 0.0 }
 0x28a   :  { %v2616_v17 = vpop.eup %2615  ;;  %2631 = vlog2.f32 %v999_v43  ;;  %v3425_v55 = vpop.f32.mrb[13].mxu0 }
 0x28b   :  { %v3427_v38 = vpop.f32.mrb[13].mxu1  ;;  %v2618_v63 = vpop.eup %2617  ;;  %2633 = vlog2.f32 %v1000_v49  ;;  %v1002_v45 = vadd.f32 1.0, %v2616_v17  ;;  %v3447_v49 = vadd.f32 %v3390_v22, %v3329_v56 }
 0x28c   :  { %v3429_v29 = vpop.f32.mrb[14].mxu0  ;;  %v3431_v3 = vpop.f32.mrb[14].mxu1  ;;  %v1001_v32 = vadd.f32 1.0, %v2618_v63  ;;  %2635 = vpow2.f32 %v950_v14  ;;  %v883_v63 = vand.u32 2147483647, %v3435_v33 }
 0x28d   :  { %v2620_v61 = vpop.eup %2619  ;;  %v3437_v2 = vpop.f32.mrb[15].mxu0  ;;  %2637 = vlog2.f32 %v1002_v45  ;;  %v2535_v45 = vld [vmem:[#allocation10 + $0x70] ss:$8 sps:$4 sm:$0xff]   ;;  %v884_v43 = vand.u32 2147483647, %v3447_v49 }
 0x28e   :  { %v1003_v23 = vadd.f32 1.0, %v2620_v61  ;;  %v3439_v41 = vpop.f32.mrb[15].mxu1  ;;  %2639 = vlog2.f32 %v1001_v32  ;;  %v2622_v14 = vpop.eup %2621  ;;  %v958_v32 = vmul.f32 1.442695, %v913_v40 }
 0x28f   :  { %v2624_v28 = vpop.eup %2623  ;;  %v1004_v50 = vadd.f32 1.0, %v2622_v14  ;;  %v3455_v14 = vadd.f32 %v3392_v48, %v3331_v57  ;;  %v2541_v48 = vld [vmem:[#allocation10 + $0x80] ss:$8 sps:$4 sm:$0xff]  }
 0x290   :  { %2641 = vlog2.f32 %v1003_v23  ;;  %v1006_v61 = vadd.f32 1.0, %v2624_v28  ;;  %v2537_v23 = vld [vmem:[#allocation10 + $0x74] ss:$8 sps:$4 sm:$0xff]   ;;  %v3460_v28 = vadd.f32 %v3394_v1, %v3334_v58  ;;  %v3470_v1 = vadd.f32 %v3396_v26, %v3336_v59 }
 0x291   :  { %2643 = vpow2.f32 %v954_v44  ;;  %v2626_v30 = vpop.eup %2625  ;;  %2036 = vmatprep.subr.bf16.mxu1 %v2537_v23  ;;  %v2543_v23 = vld [vmem:[#allocation10 + $0x84] ss:$8 sps:$4 sm:$0xff]  }
 0x292   :  { %2645 = vpow2.f32 %v956_v4  ;;  %v2628_v0 = vpop.eup %2627  ;;  %v1029_v52 = vmul.f32 0.6931472, %v2626_v30  ;;  %v3464_v30 = vsub.f32 0.0, %v883_v63  ;;  %2037 = vmatpush1.bf16.msra.mxu1 %v2535_v45  ;;  %v3477_v45 = vsub.f32 0.0, %v884_v43 }
 0x293   :  { %2647 = vlog2.f32 %v1004_v50  ;;  %v2630_v44 = vpop.eup %2629  ;;  %v1033_v17 = vmul.f32 0.6931472, %v2628_v0  ;;  %2038 = vmatprep.subr.bf16.mxu1 %v2543_v23 }
 0x294   :  { %2649 = vlog2.f32 %v1006_v61  ;;  %v2632_v4 = vpop.eup %2631  ;;  %v1124_v40 = vadd.f32 %v1092_v36, %v1029_v52  ;;  %v1031_v50 = vmul.f32 0.6931472, %v2630_v44 }
 0x295   :  { %2651 = vpow2.f32 %v960_v46  ;;  %v2634_v22 = vpop.eup %2633  ;;  %v1126_v61 = vadd.f32 %v1094_v25, %v1033_v17  ;;  %v1035_v0 = vmul.f32 0.6931472, %v2632_v4  ;;  %v886_v46 = vand.u32 2147483647, %v3455_v14 }
 0x296   :  { %2653 = vpow2.f32 %v958_v32  ;;  %v2636_v62 = vpop.eup %2635  ;;  %v1125_v36 = vadd.f32 %v1093_v42, %v1031_v50  ;;  %v1037_v52 = vmul.f32 0.6931472, %v2634_v22  ;;  %2039 = vmatpush1.bf16.msra.mxu1 %v2541_v48  ;;  %v2547_v42 = vld [vmem:[#allocation10 + $0x90] ss:$8 sps:$4 sm:$0xff]   ;;  %v2549_v22 = vld [vmem:[#allocation10 + $0x94] ss:$8 sps:$4 sm:$0xff]  }
 0x297   :  { %2655 = vtanh.f32 %v1124_v40  ;;  %v2638_v63 = vpop.eup %2637  ;;  %v1127_v25 = vadd.f32 %v1095_v53, %v1035_v0  ;;  %v1005_v17 = vadd.f32 1.0, %v2636_v62  ;;  %v885_v50 = vand.u32 2147483647, %v3460_v28  ;;  %2040 = vmatprep.subr.bf16.mxu1 %v2549_v22 }
 0x298   :  { %2657 = vtanh.f32 %v1126_v61  ;;  %v2640_v26 = vpop.eup %2639  ;;  %v1128_v32 = vadd.f32 %v1096_v54, %v1037_v52  ;;  %v1041_v44 = vmul.f32 0.6931472, %v2638_v63  ;;  %v887_v53 = vand.u32 2147483647, %v3470_v1 }
 0x299   :  { %2659 = vtanh.f32 %v1125_v36  ;;  %v1039_v40 = vmul.f32 0.6931472, %v2640_v26  ;;  %v3487_v54 = vadd.f32 %v3406_v60, %v3329_v56  ;;  %v3493_v36 = vadd.f32 %v3408_v8, %v3331_v57  ;;  %v2553_v60 = vld [vmem:[#allocation10 + $0xa0] ss:$8 sps:$4 sm:$0xff]  }
 0x29a   :  { %v2642_v4 = vpop.eup %2641  ;;  %2661 = vtanh.f32 %v1127_v25  ;;  %v1130_v43 = vadd.f32 %v1098_v12, %v1041_v44  ;;  %v3775_v12 = vmax.f32 %v3364_v34, 0.0  ;;  %v918_v26 = vsub.f32 0.0, %v886_v46  ;;  %2041 = vmatpush1.bf16.msra.mxu1 %v2547_v42 }
 0x29b   :  { %v2644_v62 = vpop.eup %2643  ;;  %2663 = vtanh.f32 %v1128_v32  ;;  %v1043_v61 = vmul.f32 0.6931472, %v2642_v4  ;;  %v1129_v0 = vadd.f32 %v1097_v13, %v1039_v40  ;;  %v2555_v32 = vld [vmem:[#allocation10 + $0xa4] ss:$8 sps:$4 sm:$0xff]   ;;  %v917_v13 = vsub.f32 0.0, %v885_v50 }
 0x29c   :  { %v2646_v48 = vpop.eup %2645  ;;  %2665 = vlog2.f32 %v1005_v17  ;;  %v1007_v23 = vadd.f32 1.0, %v2644_v62  ;;  %v919_v17 = vsub.f32 0.0, %v887_v53  ;;  %v888_v8 = vand.u32 2147483647, %v3487_v54  ;;  %2042 = vmatprep.subr.bf16.mxu1 %v2555_v32  ;;  %v2561_v50 = vld [vmem:[#allocation10 + $0xb4] ss:$8 sps:$4 sm:$0xff]  }
 0x29d   :  { %v2648_v52 = vpop.eup %2647  ;;  %2667 = vtanh.f32 %v1130_v43  ;;  %v1131_v63 = vadd.f32 %v3775_v12, %v1043_v61  ;;  %v1008_v25 = vadd.f32 1.0, %v2646_v48  ;;  %v3500_v62 = vadd.f32 %v3412_v11, %v3334_v58 }
 0x29e   :  { %v2650_v44 = vpop.eup %2649  ;;  %2669 = vtanh.f32 %v1129_v0  ;;  %v1045_v22 = vmul.f32 0.6931472, %v2648_v52  ;;  %v3776_v46 = vmax.f32 %v3371_v27, 0.0  ;;  %v890_v48 = vand.u32 2147483647, %v3493_v36  ;;  %2043 = vmatpush1.bf16.msra.mxu1 %v2553_v60 }
 0x29f   :  { %v2652_v4 = vpop.eup %2651  ;;  %2671 = vtanh.f32 %v1131_v63  ;;  %v1049_v40 = vmul.f32 0.6931472, %v2650_v44  ;;  %v3777_v0 = vmax.f32 %v3374_v10, 0.0  ;;  %v3509_v11 = vadd.f32 %v3414_v39, %v3336_v59  ;;  %v2559_v63 = vld [vmem:[#allocation10 + $0xb0] ss:$8 sps:$4 sm:$0xff]   ;;  %2044 = vmatprep.subr.bf16.mxu1 %v2561_v50 }
 0x2a0   :  { %v2654_v43 = vpop.eup %2653  ;;  %v1132_v42 = vadd.f32 %v3776_v46, %v1045_v22  ;;  %2673 = vlog2.f32 %v1007_v23  ;;  %v1010_v61 = vadd.f32 1.0, %v2652_v4  ;;  %v962_v44 = vmul.f32 1.442695, %v3464_v30  ;;  %v2567_v30 = vld [vmem:[#allocation10 + $0xc4] ss:$8 sps:$4 sm:$0xff]  }
 0x2a1   :  { %v2656_v53 = vpop.eup %2655  ;;  %v1134_v52 = vadd.f32 %v3777_v0, %v1049_v40  ;;  %2675 = vlog2.f32 %v1008_v25  ;;  %v1009_v12 = vadd.f32 1.0, %v2654_v43  ;;  %v889_v22 = vand.u32 2147483647, %v3500_v62 }
 0x2a2   :  { %v2658_v32 = vpop.eup %2657  ;;  %2677 = vtanh.f32 %v1132_v42  ;;  %v964_v25 = vmul.f32 1.442695, %v3477_v45  ;;  %v968_v40 = vmul.f32 1.442695, %v918_v26  ;;  %v920_v43 = vsub.f32 0.0, %v888_v8  ;;  %2045 = vmatpush1.bf16.msra.mxu1 %v2559_v63 }
 0x2a3   :  { %v3514_v4 = vpop.eup %2659  ;;  %2679 = vtanh.f32 %v1134_v52  ;;  %v966_v60 = vmul.f32 1.442695, %v917_v13  ;;  %v970_v46 = vmul.f32 1.442695, %v919_v17  ;;  %v3521_v42 = vadd.f32 %v3419_v16, %v3329_v56  ;;  %v2565_v26 = vld [vmem:[#allocation10 + $0xc0] ss:$8 sps:$4 sm:$0xff]   ;;  %2046 = vmatprep.subr.bf16.mxu1 %v2567_v30 }
 0x2a4   :  { %v3517_v39 = vpop.eup %2661  ;;  %2681 = vlog2.f32 %v1010_v61  ;;  %v3524_v50 = vmul.f32 %v2656_v53, %v3339_v15  ;;  %v922_v52 = vsub.f32 0.0, %v890_v48  ;;  %v891_v45 = vand.u32 2147483647, %v3509_v11  ;;  %v2573_v53 = vld [vmem:[#allocation10 + $0xd4] ss:$8 sps:$4 sm:$0xff]  }
 0x2a5   :  { %v2664_v0 = vpop.eup %2663  ;;  %2683 = vlog2.f32 %v1009_v12  ;;  %v921_v13 = vsub.f32 0.0, %v889_v22  ;;  %v892_v16 = vand.u32 2147483647, %v3521_v42  ;;  %v972_v15 = vmul.f32 1.442695, %v920_v43 }
 0x2a6   :  { %v2666_v8 = vpop.eup %2665  ;;  %v3528_v61 = vmul.f32 %v2664_v0, %v3355_v47  ;;  %2685 = vpow2.f32 %v962_v44  ;;  %v3534_v48 = vmul.f32 %v2658_v32, %v3342_v21  ;;  %v3778_v22 = vmax.f32 %v3377_v51, 0.0  ;;  %2047 = vmatpush1.bf16.msra.mxu1 %v2565_v26  ;;  %v2571_v0 = vld [vmem:[#allocation10 + $0xd0] ss:$8 sps:$4 sm:$0xff]  }
 0x2a7   :  { %v2668_v17 = vpop.eup %2667  ;;  %v1047_v23 = vmul.f32 0.6931472, %v2666_v8  ;;  %2687 = vpow2.f32 %v964_v25  ;;  %v976_v25 = vmul.f32 1.442695, %v922_v52  ;;  %v923_v43 = vsub.f32 0.0, %v891_v45  ;;  %2048 = vmatprep.subr.bf16.mxu1 %v2573_v53 }
 0x2a8   :  { %v3531_v12 = vpop.eup %2669  ;;  %v3539_v47 = vmul.f32 %v2668_v17, %v3358_v31  ;;  %2689 = vpow2.f32 %v968_v40  ;;  %v974_v32 = vmul.f32 1.442695, %v921_v13  ;;  %v924_v63 = vsub.f32 0.0, %v892_v16  ;;  %v2579_v31 = vld [vmem:[#allocation10 + $0xe4] ss:$8 sps:$4 sm:$0xff]  }
 0x2a9   :  { %v3541_v44 = vpop.eup %2671  ;;  %v1133_v30 = vadd.f32 %v3778_v22, %v1047_v23  ;;  %2691 = vpow2.f32 %v966_v60  ;;  %v1105_v23 = vmax.f32 %v3404_v5, 0.0  ;;  %v3779_v13 = vmax.f32 %v3385_v37, 0.0  ;;  %v2585_v45 = vld [vmem:[#allocation10 + $0xf4] ss:$8 sps:$4 sm:$0xff]  }
 0x2aa   :  { %v2674_v8 = vpop.eup %2673  ;;  %2693 = vpow2.f32 %v970_v46  ;;  %v3554_v46 = vadd.f32 %v3425_v55, %v3334_v58  ;;  %v978_v53 = vmul.f32 1.442695, %v923_v43  ;;  %v3562_v22 = vadd.f32 %v3421_v35, %v3331_v57  ;;  %2049 = vmatpush1.bf16.msra.mxu1 %v2571_v0 }
 0x2ab   :  { %v2676_v40 = vpop.eup %2675  ;;  %2695 = vtanh.f32 %v1133_v30  ;;  %v1051_v17 = vmul.f32 0.6931472, %v2674_v8  ;;  %v2577_v30 = vld [vmem:[#allocation10 + $0xe0] ss:$8 sps:$4 sm:$0xff]   ;;  %v980_v21 = vmul.f32 1.442695, %v924_v63  ;;  %2050 = vmatprep.subr.bf16.mxu1 %v2579_v31  ;;  %v3570_v35 = vadd.f32 %v3427_v38, %v3336_v59 }
 0x2ac   :  { %v3549_v60 = vpop.eup %2677  ;;  %v1053_v52 = vmul.f32 0.6931472, %v2676_v40  ;;  %2697 = vpow2.f32 %v972_v15  ;;  %v3780_v15 = vmax.f32 %v3388_v18, 0.0  ;;  %v1109_v63 = vmax.f32 %v3460_v28, 0.0 }
 0x2ad   :  { %v3556_v26 = vpop.eup %2679  ;;  %v1135_v16 = vadd.f32 %v3779_v13, %v1051_v17  ;;  %2699 = vpow2.f32 %v976_v25  ;;  %v3574_v17 = vmul.f32 %v3514_v4, %v3345_v9  ;;  %v893_v55 = vand.u32 2147483647, %v3554_v46 }
 0x2ae   :  { %v2682_v8 = vpop.eup %2681  ;;  %v1136_v40 = vadd.f32 %v3780_v15, %v1053_v52  ;;  %2701 = vpow2.f32 %v974_v32  ;;  %2051 = vmatpush1.bf16.msra.mxu1 %v2577_v30  ;;  %v895_v4 = vand.u32 2147483647, %v3570_v35 }
 0x2af   :  { %v2684_v19 = vpop.eup %2683  ;;  %2703 = vtanh.f32 %v1135_v16  ;;  %v1057_v25 = vmul.f32 0.6931472, %v2682_v8  ;;  %v894_v16 = vand.u32 2147483647, %v3562_v22  ;;  %v2583_v8 = vld [vmem:[#allocation10 + $0xf0] ss:$8 sps:$4 sm:$0xff]   ;;  %2052 = vmatprep.subr.bf16.mxu1 %v2585_v45 }
 0x2b0   :  { %v2686_v0 = vpop.eup %2685  ;;  %2705 = vtanh.f32 %v1136_v40  ;;  %v1055_v52 = vmul.f32 0.6931472, %v2684_v19 }
 0x2b1   :  { %v2688_v32 = vpop.eup %2687  ;;  %v1138_v31 = vadd.f32 %v1106_v20, %v1057_v25  ;;  %v1011_v13 = vadd.f32 1.0, %v2686_v0  ;;  %2707 = vpow2.f32 %v978_v53  ;;  %v3582_v20 = vadd.f32 %v3429_v29, %v3329_v56 }
 0x2b2   :  { %v2690_v15 = vpop.eup %2689  ;;  %v1137_v38 = vadd.f32 %v1105_v23, %v1055_v52  ;;  %v1012_v43 = vadd.f32 1.0, %v2688_v32  ;;  %2709 = vpow2.f32 %v980_v21  ;;  %v3586_v23 = vadd.f32 %v3431_v3, %v3331_v57  ;;  %2053 = vmatpush1.bf16.msra.mxu1 %v2583_v8 }
 0x2b3   :  { %v2692_v9 = vpop.eup %2691  ;;  %2711 = vtanh.f32 %v1138_v31  ;;  %v1014_v19 = vadd.f32 1.0, %v2690_v15  ;;  %v3590_v21 = vadd.f32 %v3437_v2, %v3334_v58  ;;  %v926_v25 = vsub.f32 0.0, %v894_v16 }
 0x2b4   :  { %v2694_v53 = vpop.eup %2693  ;;  %2713 = vtanh.f32 %v1137_v38  ;;  %v1013_v30 = vadd.f32 1.0, %v2692_v9  ;;  %v896_v0 = vand.u32 2147483647, %v3582_v20  ;;  %v3595_v29 = vmul.f32 %v3517_v39, %v3348_v24  ;;  %v2504_v38 = vld [vmem:[#allocation8 + $0x114] ss:$8 sps:$4 sm:$0xff]  }
 0x2b5   :  { %v2696_v45 = vpop.eup %2695  ;;  %2715 = vlog2.f32 %v1011_v13  ;;  %v1015_v40 = vadd.f32 1.0, %v2694_v53  ;;  %v925_v52 = vsub.f32 0.0, %v893_v55  ;;  %v898_v57 = vand.u32 2147483647, %v3586_v23  ;;  %v1797_v53 = vld [vmem:[#allocation5 + $0x18] sm:$0xff] }
 0x2b6   :  { %v2698_v56 = vpop.eup %2697  ;;  %2717 = vlog2.f32 %v1012_v43  ;;  %v1193_v58 = vmul.f32 %v3531_v12, %v3361_v6  ;;  %v927_v32 = vsub.f32 0.0, %v895_v4  ;;  %v3602_v13 = vmul.f32 %v3541_v44, %v3364_v34  ;;  %v2496_v12 = vld [vmem:[#allocation8 + $0x100] ss:$8 sps:$4 sm:$0xff]  }
 0x2b7   :  { %v2700_v3 = vpop.eup %2699  ;;  %2719 = vlog2.f32 %v1014_v19  ;;  %v1016_v2 = vadd.f32 1.0, %v2698_v56  ;;  %v928_v24 = vsub.f32 0.0, %v896_v0  ;;  %v3608_v55 = vmul.f32 %v3549_v60, %v3371_v27  ;;  %v1795_v4 = vld [vmem:[#allocation5 + $0x8] sm:$0xff]  ;;  %v1796_v0 = vld [vmem:[#allocation5 + $0x10] sm:$0xff] }
 0x2b8   :  { %v2702_v31 = vpop.eup %2701  ;;  %2721 = vlog2.f32 %v1013_v30  ;;  %v1018_v16 = vadd.f32 1.0, %v2700_v3  ;;  %v984_v6 = vmul.f32 1.442695, %v926_v25  ;;  %v3612_v15 = vmul.f32 %v3556_v26, %v3374_v10  ;;  %v1794_v30 = vld [vmem:[#allocation5] sm:$0xff]  ;;  %v1799_v56 = vld [vmem:[#allocation5 + $0x28] sm:$0xff] }
 0x2b9   :  { %v3604_v39 = vpop.eup %2703  ;;  %2723 = vlog2.f32 %v1015_v40  ;;  %v1017_v43 = vadd.f32 1.0, %v2702_v31  ;;  %v982_v34 = vmul.f32 1.442695, %v925_v52  ;;  %v930_v44 = vsub.f32 0.0, %v898_v57  ;;  %v1801_v52 = vld [vmem:[#allocation5 + $0x38] sm:$0xff] }
 0x2ba   :  { %v2706_v8 = vpop.eup %2705  ;;  %2725 = vlog2.f32 %v1016_v2  ;;  %v986_v27 = vmul.f32 1.442695, %v927_v32  ;;  %v1221_v60 = vpack.c.bf16 %v1193_v58, %v3574_v17  ;;  %v1197_v25 = vmul.f32 %v2696_v45, %v3377_v51 }
 0x2bb   :  { %v2708_v9 = vpop.eup %2707  ;;  %v3615_v19 = vmul.f32 %v2706_v8, %v3388_v18  ;;  %2727 = vlog2.f32 %v1018_v16  ;;  %v988_v26 = vmul.f32 1.442695, %v928_v24  ;;  %v1223_v17 = vpack.c.bf16 %v3602_v13, %v3595_v29  ;;  %v2502_v24 = vld [vmem:[#allocation8 + $0x110] ss:$8 sps:$4 sm:$0xff]  }
 0x2bc   :  { %v2710_v40 = vpop.eup %2709  ;;  %2729 = vlog2.f32 %v1017_v43  ;;  %v1019_v10 = vadd.f32 1.0, %v2708_v9  ;;  %1664 = vmatprep.mubr.bf16.mxu0 %v1221_v60  ;;  %v992_v51 = vmul.f32 1.442695, %v930_v44  ;;  %v3781_v45 = vpack.c.bf16 %v3528_v61, %v3524_v50  ;;  %v2510_v44 = vld [vmem:[#allocation8 + $0x124] ss:$8 sps:$4 sm:$0xff]  }
 0x2bd   :  { %v2712_v57 = vpop.eup %2711  ;;  %v1020_v3 = vadd.f32 1.0, %v2710_v40  ;;  %2731 = vpow2.f32 %v984_v6  ;;  %v1224_v18 = vpack.c.bf16 %v3615_v19, %v3608_v55  ;;  %v1811_v32 = vpack.c.bf16 %v1797_v53, %v1795_v4 }
 0x2be   :  { %v2714_v58 = vpop.eup %2713  ;;  %v3624_v2 = vmul.f32 %v2712_v57, %v3399_v7  ;;  %2733 = vlog2.f32 %v1019_v10  ;;  %1665 = vmatmul.mubr.bf16.vlgmr.msra.gmra.mrb[16].mxu0 %v3781_v45  ;;  %v1810_v55 = vpack.c.bf16 %v1796_v0, %v1794_v30  ;;  %v1813_v43 = vpack.c.bf16 %v1801_v52, %v1799_v56  ;;  %v1803_v52 = vld [vmem:[#allocation5 + $0x48] sm:$0xff]  ;;  %v1805_v57 = vld [vmem:[#allocation5 + $0x58] sm:$0xff] }
 0x2bf   :  { %v2716_v31 = vpop.eup %2715  ;;  %v1201_v16 = vmul.f32 %v2714_v58, %v3404_v5  ;;  %2735 = vlog2.f32 %v1020_v3  ;;  %1706 = vmatpush1.bf16.msra.mxu0 %v2496_v12  ;;  %v1111_v7 = vmax.f32 %v3470_v1, 0.0  ;;  %v1112_v9 = vmax.f32 %v3487_v54, 0.0  ;;  %2054 = vmatprep.mubr.bf16.mxu1 %v1811_v32  ;;  %v2508_v5 = vld [vmem:[#allocation8 + $0x120] ss:$8 sps:$4 sm:$0xff]  }
 0x2c0   :  { %v2718_v6 = vpop.eup %2717  ;;  %v1059_v8 = vmul.f32 0.6931472, %v2716_v31  ;;  %2737 = vpow2.f32 %v982_v34  ;;  %1707 = vmatprep.subr.bf16.mxu0 %v2504_v38  ;;  %2055 = vmatmul.mubr.bf16.vlgmr.msra.gmra.mrb[16].mxu1 %v1810_v55  ;;  %v1226_v12 = vpack.c.bf16 %v3624_v2, %v3612_v15  ;;  %v3782_v4 = vmax.f32 %v3435_v33, 0.0  ;;  %v1798_v34 = vld [vmem:[#allocation5 + $0x20] sm:$0xff]  ;;  %v1800_v38 = vld [vmem:[#allocation5 + $0x30] sm:$0xff] }
 0x2c1   :  { %v2720_v50 = vpop.eup %2719  ;;  %v1061_v61 = vmul.f32 0.6931472, %v2718_v6  ;;  %2739 = vpow2.f32 %v986_v27  ;;  %v1225_v19 = vpack.c.bf16 %v1201_v16, %v1197_v25  ;;  %v1114_v40 = vmax.f32 %v3493_v36, 0.0  ;;  %2064 = vmatprep.mubr.bf16.mxu1 %v1813_v43  ;;  %v2516_v31 = vld [vmem:[#allocation8 + $0x134] ss:$8 sps:$4 sm:$0xff]  }
 0x2c2   :  { %v2722_v60 = vpop.eup %2721  ;;  %v1139_v53 = vadd.f32 %v3782_v4, %v1059_v8  ;;  %v1065_v30 = vmul.f32 0.6931472, %v2720_v50  ;;  %2741 = vpow2.f32 %v988_v26  ;;  %v3783_v27 = vmax.f32 %v3447_v49, 0.0 }
 0x2c3   :  { %v2724_v10 = vpop.eup %2723  ;;  %v1063_v0 = vmul.f32 0.6931472, %v2722_v60  ;;  %v1113_v56 = vmax.f32 %v3500_v62, 0.0  ;;  %2743 = vpow2.f32 %v992_v51  ;;  %1708 = vmatpush1.bf16.msra.mxu0 %v2502_v24  ;;  %1674 = vmatprep.mubr.bf16.mxu0 %v1225_v19  ;;  %v3784_v58 = vmax.f32 %v3455_v14, 0.0 }
 0x2c4   :  { %v1140_v25 = vadd.f32 %v3783_v27, %v1061_v61  ;;  %v2726_v3 = vpop.eup %2725  ;;  %2745 = vtanh.f32 %v1139_v53  ;;  %v1067_v45 = vmul.f32 0.6931472, %v2724_v10  ;;  %v3644_v32 = vadd.f32 %v3439_v41, %v3336_v59  ;;  %1709 = vmatprep.subr.bf16.mxu0 %v2510_v44  ;;  %v2514_v44 = vld [vmem:[#allocation8 + $0x130] ss:$8 sps:$4 sm:$0xff]  }
 0x2c5   :  { %v1142_v26 = vadd.f32 %v3784_v58, %v1065_v30  ;;  %v2728_v16 = vpop.eup %2727  ;;  %v1141_v51 = vadd.f32 %v1109_v63, %v1063_v0  ;;  %v1069_v24 = vmul.f32 0.6931472, %v2726_v3  ;;  %v1812_v55 = vpack.c.bf16 %v1800_v38, %v1798_v34  ;;  %v2522_v30 = vld [vmem:[#allocation8 + $0x144] ss:$8 sps:$4 sm:$0xff]   ;;  %v1804_v10 = vld [vmem:[#allocation5 + $0x50] sm:$0xff] }
 0x2c6   :  { %2747 = vtanh.f32 %v1140_v25  ;;  %v2730_v43 = vpop.eup %2729  ;;  %v1143_v6 = vadd.f32 %v1111_v7, %v1067_v45  ;;  %v1073_v8 = vmul.f32 0.6931472, %v2728_v16  ;;  %1675 = vmatmul.mubr.bf16.gmra.mrb[20].mxu0 %v1224_v18  ;;  %v1815_v50 = vpack.c.bf16 %v1805_v57, %v1803_v52  ;;  %v2520_v0 = vld [vmem:[#allocation8 + $0x140] ss:$8 sps:$4 sm:$0xff]   ;;  %v1809_v57 = vld [vmem:[#allocation5 + $0x78] sm:$0xff] }
 0x2c7   :  { %2749 = vtanh.f32 %v1142_v26  ;;  %v2732_v61 = vpop.eup %2731  ;;  %v1144_v19 = vadd.f32 %v1112_v9, %v1069_v24  ;;  %v1071_v59 = vmul.f32 0.6931472, %v2730_v43  ;;  %v897_v41 = vand.u32 2147483647, %v3590_v21  ;;  %1710 = vmatpush1.bf16.msra.mxu0 %v2508_v5  ;;  %v1802_v5 = vld [vmem:[#allocation5 + $0x40] sm:$0xff]  ;;  %v1807_v52 = vld [vmem:[#allocation5 + $0x68] sm:$0xff] }
 0x2c8   :  { %2751 = vtanh.f32 %v1141_v51  ;;  %v2734_v60 = vpop.eup %2733  ;;  %v1146_v4 = vadd.f32 %v1114_v40, %v1073_v8  ;;  %v1022_v63 = vadd.f32 1.0, %v2732_v61  ;;  %v899_v53 = vand.u32 2147483647, %v3644_v32  ;;  %1711 = vmatprep.subr.bf16.mxu0 %v2516_v31  ;;  %2065 = vmatmul.mubr.bf16.gmra.mrb[20].mxu1 %v1812_v55  ;;  %v2528_v58 = vld [vmem:[#allocation8 + $0x154] ss:$8 sps:$4 sm:$0xff]  }
 0x2c9   :  { %2753 = vtanh.f32 %v1143_v6  ;;  %v3650_v7 = vpop.eup %2735  ;;  %v1145_v18 = vadd.f32 %v1113_v56, %v1071_v59  ;;  %v1075_v34 = vmul.f32 0.6931472, %v2734_v60  ;;  %v1115_v9 = vmax.f32 %v3509_v11, 0.0  ;;  %2074 = vmatprep.mubr.bf16.mxu1 %v1815_v50  ;;  %v2526_v50 = vld [vmem:[#allocation8 + $0x150] ss:$8 sps:$4 sm:$0xff]  }
 0x2ca   :  { %2755 = vtanh.f32 %v1144_v19  ;;  %v2738_v38 = vpop.eup %2737  ;;  %v929_v25 = vsub.f32 0.0, %v897_v41  ;;  %v931_v56 = vsub.f32 0.0, %v899_v53  ;;  %v1814_v31 = vpack.c.bf16 %v1804_v10, %v1802_v5  ;;  %v2534_v59 = vld [vmem:[#allocation8 + $0x164] ss:$8 sps:$4 sm:$0xff]  }
 0x2cb   :  { %2757 = vtanh.f32 %v1146_v4  ;;  %v2740_v27 = vpop.eup %2739  ;;  %v1147_v40 = vadd.f32 %v1115_v9, %v1075_v34  ;;  %1712 = vmatpush1.bf16.msra.mxu0 %v2514_v44  ;;  %v1817_v24 = vpack.c.bf16 %v1809_v57, %v1807_v52  ;;  %v3655_v43 = vmul.f32 %v3604_v39, %v3385_v37  ;;  %v1806_v37 = vld [vmem:[#allocation5 + $0x60] sm:$0xff]  ;;  %v1808_v39 = vld [vmem:[#allocation5 + $0x70] sm:$0xff] }
 0x2cc   :  { %2759 = vtanh.f32 %v1145_v18  ;;  %v2742_v3 = vpop.eup %2741  ;;  %1713 = vmatprep.subr.bf16.mxu0 %v2522_v30  ;;  %v990_v8 = vmul.f32 1.442695, %v929_v25  ;;  %v994_v19 = vmul.f32 1.442695, %v931_v56  ;;  %v2532_v4 = vld [vmem:[#allocation8 + $0x160] ss:$8 sps:$4 sm:$0xff]  }
 0x2cd   :  { %2761 = vlog2.f32 %v1022_v63  ;;  %v2744_v26 = vpop.eup %2743  ;;  %v1024_v45 = vadd.f32 1.0, %v2742_v3  ;;  %v2540_v18 = vld [vmem:[#allocation8 + $0x174] ss:$8 sps:$4 sm:$0xff]   ;;  %v1077_v10 = vmul.f32 0.6931472, %v3650_v7  ;;  %v1021_v52 = vadd.f32 1.0, %v2738_v38 }
 0x2ce   :  { %2763 = vtanh.f32 %v1147_v40  ;;  %v2746_v16 = vpop.eup %2745  ;;  %v1026_v51 = vadd.f32 1.0, %v2744_v26  ;;  %v1816_v40 = vpack.c.bf16 %v1808_v39, %v1806_v37  ;;  %v1023_v56 = vadd.f32 1.0, %v2740_v27  ;;  %v2538_v26 = vld [vmem:[#allocation8 + $0x170] ss:$8 sps:$4 sm:$0xff]   ;;  %v2546_v38 = vld [vmem:[#allocation8 + $0x184] ss:$8 sps:$4 sm:$0xff]  }
 0x2cf   :  { %v3658_v6 = vmul.f32 %v2746_v16, %v3435_v33  ;;  %1714 = vmatpush1.bf16.msra.mxu0 %v2520_v0  ;;  %2765 = vlog2.f32 %v1024_v45  ;;  %v2550_v39 = vld [vmem:[#allocation8 + $0x190] ss:$8 sps:$4 sm:$0xff]  }
 0x2d0   :  { %v2748_v55 = vpop.eup %2747  ;;  %1715 = vmatprep.subr.bf16.mxu0 %v2528_v58  ;;  %2075 = vmatmul.mubr.bf16.gmra.mrb[24].mxu1 %v1814_v31  ;;  %2767 = vlog2.f32 %v1026_v51  ;;  %v1116_v58 = vmax.f32 %v3521_v42, 0.0  ;;  %v1120_v51 = vmax.f32 %v3582_v20, 0.0 }
 0x2d1   :  { %v2750_v61 = vpop.eup %2749  ;;  %v1227_v44 = vpack.c.bf16 %v3658_v6, %v3655_v43  ;;  %2084 = vmatprep.mubr.bf16.mxu1 %v1817_v24  ;;  %2769 = vpow2.f32 %v990_v8  ;;  %v1204_v53 = vmul.f32 %v2748_v55, %v3447_v49  ;;  %v2544_v24 = vld [vmem:[#allocation8 + $0x180] ss:$8 sps:$4 sm:$0xff]  }
 0x2d2   :  { %v2752_v41 = vpop.eup %2751  ;;  %2771 = vpow2.f32 %v994_v19  ;;  %v3665_v9 = vmul.f32 %v2750_v61, %v3455_v14  ;;  %v1148_v27 = vadd.f32 %v1116_v58, %v1077_v10  ;;  %v2552_v61 = vld [vmem:[#allocation8 + $0x194] ss:$8 sps:$4 sm:$0xff]  }
 0x2d3   :  { %v2754_v60 = vpop.eup %2753  ;;  %1716 = vmatpush1.bf16.msra.mxu0 %v2526_v50  ;;  %v1205_v0 = vmul.f32 %v2752_v41, %v3460_v28  ;;  %2773 = vlog2.f32 %v1021_v52  ;;  %v1122_v50 = vmax.f32 %v3586_v23, 0.0 }
 0x2d4   :  { %v2756_v33 = vpop.eup %2755  ;;  %1717 = vmatprep.subr.bf16.mxu0 %v2534_v59  ;;  %2775 = vlog2.f32 %v1023_v56 }
 0x2d5   :  { %v2758_v63 = vpop.eup %2757  ;;  %v1208_v30 = vmul.f32 %v2756_v33, %v3487_v54  ;;  %2777 = vtanh.f32 %v1148_v27  ;;  %v2558_v33 = vld [vmem:[#allocation8 + $0x1a4] ss:$8 sps:$4 sm:$0xff]   ;;  %v2568_v27 = vld [vmem:[#allocation8 + $0x1c0] ss:$8 sps:$4 sm:$0xff]  }
 0x2d6   :  { %v2760_v34 = vpop.eup %2759  ;;  %v3668_v5 = vmul.f32 %v2758_v63, %v3493_v36  ;;  %v3676_v36 = vmul.f32 %v2754_v60, %v3470_v1  ;;  %v2556_v63 = vld [vmem:[#allocation8 + $0x1a0] ss:$8 sps:$4 sm:$0xff]  }
 0x2d7   :  { %v2762_v25 = vpop.eup %2761  ;;  %v1209_v49 = vmul.f32 %v2760_v34, %v3500_v62  ;;  %v1228_v54 = vpack.c.bf16 %v1208_v30, %v1204_v53  ;;  %1718 = vmatpush1.bf16.msra.mxu0 %v2532_v4  ;;  %v1118_v62 = vmax.f32 %v3562_v22, 0.0  ;;  %v2564_v30 = vld [vmem:[#allocation8 + $0x1b4] ss:$8 sps:$4 sm:$0xff]  }
 0x2d8   :  { %v2764_v57 = vpop.eup %2763  ;;  %v1081_v3 = vmul.f32 0.6931472, %v2762_v25  ;;  %v1230_v14 = vpack.c.bf16 %v3668_v5, %v3665_v9  ;;  %1719 = vmatprep.subr.bf16.mxu0 %v2540_v18  ;;  %2085 = vmatmul.mubr.bf16.gmra.mrb[28].mxu1 %v1816_v40  ;;  %v2562_v40 = vld [vmem:[#allocation8 + $0x1b0] ss:$8 sps:$4 sm:$0xff]  }
 0x2d9   :  { %v3679_v7 = vmul.f32 %v2764_v57, %v3509_v11  ;;  %v1229_v28 = vpack.c.bf16 %v1209_v49, %v1205_v0  ;;  %v2766_v1 = vpop.eup %2765  ;;  %v1117_v0 = vmax.f32 %v3554_v46, 0.0  ;;  %v2570_v49 = vld [vmem:[#allocation8 + $0x1c4] ss:$8 sps:$4 sm:$0xff]  }
 0x2da   :  { %v1150_v31 = vadd.f32 %v1118_v62, %v1081_v3  ;;  %v2768_v11 = vpop.eup %2767  ;;  %v1085_v16 = vmul.f32 0.6931472, %v2766_v1 }
 0x2db   :  { %1684 = vmatprep.mubr.bf16.mxu0 %v1229_v28  ;;  %v1231_v45 = vpack.c.bf16 %v3679_v7, %v3676_v36  ;;  %1720 = vmatpush1.bf16.msra.mxu0 %v2538_v26  ;;  %v2770_v55 = vpop.eup %2769  ;;  %v1089_v8 = vmul.f32 0.6931472, %v2768_v11  ;;  %v1121_v11 = vmax.f32 %v3590_v21, 0.0 }
 0x2dc   :  { %1685 = vmatmul.mubr.bf16.gmra.mrb[24].mxu0 %v1228_v54  ;;  %1721 = vmatprep.subr.bf16.mxu0 %v2546_v38  ;;  %v2772_v19 = vpop.eup %2771  ;;  %v1152_v59 = vadd.f32 %v1120_v51, %v1085_v16  ;;  %v1025_v41 = vadd.f32 1.0, %v2770_v55  ;;  %2779 = vtanh.f32 %v1150_v31  ;;  %v1119_v54 = vmax.f32 %v3570_v35, 0.0  ;;  %v2576_v51 = vld [vmem:[#allocation8 + $0x1d4] ss:$8 sps:$4 sm:$0xff]  }
 0x2dd   :  { %v1154_v60 = vadd.f32 %v1122_v50, %v1089_v8  ;;  %v1027_v37 = vadd.f32 1.0, %v2772_v19  ;;  %v2774_v4 = vpop.eup %2773  ;;  %v2574_v8 = vld [vmem:[#allocation8 + $0x1d0] ss:$8 sps:$4 sm:$0xff]   ;;  %v2580_v50 = vld [vmem:[#allocation8 + $0x1e0] ss:$8 sps:$4 sm:$0xff]  }
 0x2de   :  { %2781 = vtanh.f32 %v1152_v59  ;;  %v2776_v53 = vpop.eup %2775  ;;  %v1079_v18 = vmul.f32 0.6931472, %v2774_v4  ;;  %v2586_v19 = vld [vmem:[#allocation8 + $0x1f0] ss:$8 sps:$4 sm:$0xff]  }
 0x2df   :  { %1722 = vmatpush1.bf16.msra.mxu0 %v2544_v24  ;;  %2783 = vtanh.f32 %v1154_v60  ;;  %v2778_v34 = vpop.eup %2777  ;;  %v1083_v10 = vmul.f32 0.6931472, %v2776_v53 }
 0x2e0   :  { %1723 = vmatprep.subr.bf16.mxu0 %v2552_v61  ;;  %2785 = vlog2.f32 %v1025_v41  ;;  %v1212_v3 = vmul.f32 %v2778_v34, %v3521_v42  ;;  %v1149_v56 = vadd.f32 %v1117_v0, %v1079_v18  ;;  %v1123_v42 = vmax.f32 %v3644_v32, 0.0  ;;  %v2588_v61 = vld [vmem:[#allocation8 + $0x1f4] ss:$8 sps:$4 sm:$0xff]  }
 0x2e1   :  { %2787 = vlog2.f32 %v1027_v37  ;;  %v1151_v62 = vadd.f32 %v1119_v54, %v1083_v10  ;;  %v3785_v18 = vpack.c.bf16 %v3539_v47, %v3534_v48  ;;  %v1850_v48 = vld [vmem:[%s3766_s9] sm:$0x3]  ;;  %s2970_s9 = smov [#allocation12]  }
 0x2e2   :  { %2789 = vtanh.f32 %v1149_v56  ;;  %v3786_v47 = vld [vmem:[#allocation19_spill] sm:$0xff]  ;;  %s2128_s13 = sshll.u32 %s2970_s9, 4  ;;  %s2129_s13 = int_to_ptr.vmem [resolvable:$true] %s2128_s13 }
 0x2e3   :  { %1724 = vmatpush1.bf16.msra.mxu0 %v2550_v39  ;;  %2791 = vtanh.f32 %v1151_v62  ;;  %s2907_s14 = scalar_lea.vmem %s2129_s13, 2048  ;;  %p2912_p13 = scmp.lt.s32.totalorder %s2129_s13, %s2129_s13 }
 0x2e4   :  { %1725 = vmatprep.subr.bf16.mxu0 %v2558_v33  ;;  %p2908_p12 = scmp.ne.s32.totalorder %s2129_s13, %s2907_s14  ;;  %p2913_p0 = scmp.lt.s32.totalorder %s2907_s14, %s2907_s14 }
 0x2e6   :  { %v2780_v25 = vpop.eup %2779  ;;  %p2914_p1 = por %p2913_p0, %p2912_p13 }
 0x2e7   :  { %1726 = vmatpush1.bf16.msra.mxu0 %v2556_v63  ;;  %v1214_v26 = vmul.f32 %v2780_v25, %v3562_v22 }
 0x2e8   :  { %1727 = vmatprep.subr.bf16.mxu0 %v2564_v30  ;;  %v2782_v52 = vpop.eup %2781  ;;  %p2915_p2 = pnand %p2914_p1, %p2908_p12 }
 0x2e9   :  { %v2784_v57 = vpop.eup %2783  ;;  %v1216_v58 = vmul.f32 %v2782_v52, %v3582_v20 }
 0x2ea   :  { %v2786_v28 = vpop.eup %2785  ;;  %v1218_v38 = vmul.f32 %v2784_v57, %v3586_v23  ;;  %v2582_v23 = vld [vmem:[#allocation8 + $0x1e4] ss:$8 sps:$4 sm:$0xff]  }
 0x2eb   :  { %1728 = vmatpush1.bf16.msra.mxu0 %v2562_v40  ;;  %v2788_v1 = vpop.eup %2787  ;;  %v1087_v31 = vmul.f32 0.6931472, %v2786_v28  ;;  %v1232_v16 = vpack.c.bf16 %v1216_v58, %v1212_v3 }
 0x2ec   :  { %1729 = vmatprep.subr.bf16.mxu0 %v2570_v49  ;;  %v1091_v24 = vmul.f32 0.6931472, %v2788_v1  ;;  %v1234_v55 = vpack.c.bf16 %v1218_v38, %v1214_v26  ;;  %v2790_v59 = vpop.eup %2789 }
 0x2ed   :  { %v1153_v20 = vadd.f32 %v1121_v11, %v1087_v31  ;;  %v2792_v41 = vpop.eup %2791  ;;  %v1213_v39 = vmul.f32 %v2790_v59, %v3554_v46  ;;  %v1855_v46 = vrot.slane %v1850_v48, %v3786_v47 }
 0x2ee   :  { %v1155_v22 = vadd.f32 %v1123_v42, %v1091_v24  ;;  %v1215_v4 = vmul.f32 %v2792_v41, %v3570_v35  ;;  %v3787_v35 = vld [vmem:[#allocation20_spill] sm:$0xff] }
 0x2ef   :  { %1730 = vmatpush1.bf16.msra.mxu0 %v2568_v27  ;;  %2793 = vtanh.f32 %v1153_v20 }
 0x2f0   :  { %1731 = vmatprep.subr.bf16.mxu0 %v2576_v51  ;;  %2795 = vtanh.f32 %v1155_v22 }
 0x2f3   :  { %1732 = vmatpush1.bf16.msra.mxu0 %v2574_v8 }
 0x2f4   :  { %1733 = vmatprep.subr.bf16.mxu0 %v2582_v23 }
 0x2f7   :  { %1734 = vmatpush1.bf16.msra.mxu0 %v2580_v50 }
 0x2f8   :  { %1735 = vmatprep.subr.bf16.mxu0 %v2588_v61 }
 0x2f9   :  { %v2794_v60 = vpop.eup %2793 }
 0x2fa   :  { %v2796_v37 = vpop.eup %2795  ;;  %v1217_v33 = vmul.f32 %v2794_v60, %v3590_v21  ;;  %v1859_v21 = vrot.slane %v1850_v48, %v3787_v35 }
 0x2fb   :  { %1736 = vmatpush1.bf16.msra.mxu0 %v2586_v19  ;;  %v1219_v63 = vmul.f32 %v2796_v37, %v3644_v32 }
 0x2fc   :  { %v1233_v53 = vpack.c.bf16 %v1217_v33, %v1213_v39 }
 0x2fd   :  { %v1235_v30 = vpack.c.bf16 %v1219_v63, %v1215_v4 }
 0x2fe   :  { %1694 = vmatprep.mubr.bf16.mxu0 %v1233_v53 }
 0x2ff   :  { %1695 = vmatmul.mubr.bf16.gmra.mrb[28].mxu0 %v1232_v16 }
 0x300   :  { %1737 = vmatprep.mubr.bf16.mxu0 %v1223_v17 }
 0x307   :  { %1738 = vmatmul.mubr.bf16.vlgmr.msra.gmra.mrb[16].mxu0 %v3785_v18 }
 0x308   :  { %1747 = vmatprep.mubr.bf16.mxu0 %v1227_v44 }
 0x30f   :  { %1748 = vmatmul.mubr.bf16.gmra.mrb[20].mxu0 %v1226_v12 }
 0x310   :  { %1757 = vmatprep.mubr.bf16.mxu0 %v1231_v45 }
 0x317   :  { %1758 = vmatmul.mubr.bf16.gmra.mrb[24].mxu0 %v1230_v14 }
 0x318   :  { %1767 = vmatprep.mubr.bf16.mxu0 %v1235_v30 }
 0x31f   :  { %1768 = vmatmul.mubr.bf16.gmra.mrb[28].mxu0 %v1234_v55 }
 0x393   :  { %v2056_v29 = vpop.f32.mrb[16].mxu1 }
 0x394   :  { %v2057_v13 = vadd.f32 %v2056_v29, %v1855_v46  ;;  %v2058_v15 = vpop.f32.mrb[17].mxu1 }
 0x395   :  { %v2059_v17 = vadd.f32 %v2058_v15, %v1859_v21  ;;  %v2060_v2 = vpop.f32.mrb[18].mxu1 }
 0x396   :  { %2095 = vst [vmem:[#allocation12] sm:$0xff] %v2057_v13  ;;  %v2061_v12 = vadd.f32 %v2060_v2, %v1855_v46  ;;  %v2062_v32 = vpop.f32.mrb[19].mxu1 }
 0x397   :  { %2096 = vst [vmem:[#allocation12 + $0x8] sm:$0xff] %v2059_v17  ;;  %v2063_v43 = vadd.f32 %v2062_v32, %v1859_v21 }
 0x398   :  { %2097 = vst [vmem:[#allocation12 + $0x10] sm:$0xff] %v2061_v12 }
 0x399   :  { %2098 = vst [vmem:[#allocation12 + $0x18] sm:$0xff] %v2063_v43 }
 0x39b   :  { %v2066_v6 = vpop.f32.mrb[20].mxu1 }
 0x39c   :  { %v2067_v44 = vadd.f32 %v2066_v6, %v1855_v46  ;;  %v2068_v9 = vpop.f32.mrb[21].mxu1 }
 0x39d   :  { %v2069_v5 = vadd.f32 %v2068_v9, %v1859_v21  ;;  %v2070_v14 = vpop.f32.mrb[22].mxu1 }
 0x39e   :  { %2099 = vst [vmem:[#allocation12 + $0x20] sm:$0xff] %v2067_v44  ;;  %v2071_v36 = vadd.f32 %v2070_v14, %v1855_v46  ;;  %v2072_v7 = vpop.f32.mrb[23].mxu1 }
 0x39f   :  { %2100 = vst [vmem:[#allocation12 + $0x28] sm:$0xff] %v2069_v5  ;;  %v2073_v45 = vadd.f32 %v2072_v7, %v1859_v21 }
 0x3a0   :  { %2101 = vst [vmem:[#allocation12 + $0x30] sm:$0xff] %v2071_v36 }
 0x3a1   :  { %2102 = vst [vmem:[#allocation12 + $0x38] sm:$0xff] %v2073_v45 }
 0x3a3   :  { %v2076_v34 = vpop.f32.mrb[24].mxu1 }
 0x3a4   :  { %v2077_v10 = vadd.f32 %v2076_v34, %v1855_v46  ;;  %v2078_v40 = vpop.f32.mrb[25].mxu1 }
 0x3a5   :  { %v2079_v25 = vadd.f32 %v2078_v40, %v1859_v21  ;;  %v2080_v0 = vpop.f32.mrb[26].mxu1 }
 0x3a6   :  { %2103 = vst [vmem:[#allocation12 + $0x40] sm:$0xff] %v2077_v10  ;;  %v2081_v49 = vadd.f32 %v2080_v0, %v1855_v46  ;;  %v2082_v52 = vpop.f32.mrb[27].mxu1 }
 0x3a7   :  { %2104 = vst [vmem:[#allocation12 + $0x48] sm:$0xff] %v2079_v25  ;;  %v2083_v54 = vadd.f32 %v2082_v52, %v1859_v21 }
 0x3a8   :  { %2105 = vst [vmem:[#allocation12 + $0x50] sm:$0xff] %v2081_v49 }
 0x3a9   :  { %2106 = vst [vmem:[#allocation12 + $0x58] sm:$0xff] %v2083_v54 }
 0x3ab   :  { %v2086_v57 = vpop.f32.mrb[28].mxu1 }
 0x3ac   :  { %v2087_v3 = vadd.f32 %v2086_v57, %v1855_v46  ;;  %v2088_v56 = vpop.f32.mrb[29].mxu1 }
 0x3ad   :  { %v2089_v58 = vadd.f32 %v2088_v56, %v1859_v21  ;;  %v2090_v28 = vpop.f32.mrb[30].mxu1 }
 0x3ae   :  { %2107 = vst [vmem:[#allocation12 + $0x60] sm:$0xff] %v2087_v3  ;;  %v2091_v26 = vadd.f32 %v2090_v28, %v1855_v46  ;;  %v2092_v62 = vpop.f32.mrb[31].mxu1 }
 0x3af   :  { %2108 = vst [vmem:[#allocation12 + $0x68] sm:$0xff] %v2089_v58  ;;  %v2093_v38 = vadd.f32 %v2092_v62, %v1859_v21 }
 0x3b0   :  { %2109 = vst [vmem:[#allocation12 + $0x70] sm:$0xff] %v2091_v26 }
 0x3b1   :  { %2110 = vst [vmem:[#allocation12 + $0x78] sm:$0xff] %v2093_v38 }
 0x3b2   :  { %2918 = shalt.err (!%p2915_p2)
}
 0x3b3   :  { %s2919_s27 = scalar_lea.hbm %s3768_s11, 2048 }
 0x3b4   :  { %p2920_p3 = scmp.ne.s32.totalorder %s3768_s11, %s2919_s27  ;;  %p2923_p4 = scmp.lt.u32.totalorder %s2919_s27, %s3768_s11 }
 0x3b6   :  { %p2925_p5 = pnand %p2923_p4, %p2920_p3 }
 0x3b8   :  { %2928 = shalt.err (!%p2925_p5)
}
 0x3b9   :  { %2134 = dma.vmem_to_hbm [thread:$0]  %s2129_s13, 2048, %s3768_s11, [#allocation13], %s2963_s29, %s2963_s29, %s2964_s30  }
 0x3ba   :  { %v1300_v27 = vld [vmem:[%s3764_s7] sm:$0x3]  ;;  %s2971_s7 = smov [#allocation11]  }
 0x3bb   :  { %v1305_v1 = vrot.slane %v1300_v27, %v3786_v47  ;;  %v1309_v31 = vrot.slane %v1300_v27, %v3787_v35  ;;  %s2116_s11 = sshll.u32 %s2971_s7, 4  ;;  %s2117_s11 = int_to_ptr.vmem [resolvable:$true] %s2116_s11 }
 0x3bc   :  { %s2929_s24 = scalar_lea.vmem %s2117_s11, 2048  ;;  %p2934_p7 = scmp.lt.s32.totalorder %s2117_s11, %s2117_s11 }
 0x3bd   :  { %p2930_p6 = scmp.ne.s32.totalorder %s2117_s11, %s2929_s24  ;;  %p2935_p8 = scmp.lt.s32.totalorder %s2929_s24, %s2929_s24 }
 0x3bf   :  { %p2936_p9 = por %p2935_p8, %p2934_p7 }
 0x3c1   :  { %p2937_p10 = pnand %p2936_p9, %p2930_p6 }
 0x3da   :  { %v1739_v11 = vpop.f32.mrb[16].mxu0 }
 0x3db   :  { %v2306_v16 = vadd.f32 %v1739_v11, %v1305_v1  ;;  %v1741_v51 = vpop.f32.mrb[17].mxu0 }
 0x3dc   :  { %v2307_v24 = vadd.f32 %v1741_v51, %v1309_v31  ;;  %v1743_v42 = vpop.f32.mrb[18].mxu0 }
 0x3dd   :  { %1778 = vst [vmem:[#allocation11] sm:$0xff] %v2306_v16  ;;  %v2308_v55 = vadd.f32 %v1743_v42, %v1305_v1  ;;  %v1745_v20 = vpop.f32.mrb[19].mxu0 }
 0x3de   :  { %1779 = vst [vmem:[#allocation11 + $0x8] sm:$0xff] %v2307_v24  ;;  %v2309_v22 = vadd.f32 %v1745_v20, %v1309_v31 }
 0x3df   :  { %1780 = vst [vmem:[#allocation11 + $0x10] sm:$0xff] %v2308_v55 }
 0x3e0   :  { %1781 = vst [vmem:[#allocation11 + $0x18] sm:$0xff] %v2309_v22 }
 0x3e2   :  { %v1749_v8 = vpop.f32.mrb[20].mxu0 }
 0x3e3   :  { %v2310_v23 = vadd.f32 %v1749_v8, %v1305_v1  ;;  %v1751_v50 = vpop.f32.mrb[21].mxu0 }
 0x3e4   :  { %v2311_v61 = vadd.f32 %v1751_v50, %v1309_v31  ;;  %v1753_v19 = vpop.f32.mrb[22].mxu0 }
 0x3e5   :  { %1782 = vst [vmem:[#allocation11 + $0x20] sm:$0xff] %v2310_v23  ;;  %v2312_v59 = vadd.f32 %v1753_v19, %v1305_v1  ;;  %v1755_v41 = vpop.f32.mrb[23].mxu0 }
 0x3e6   :  { %1783 = vst [vmem:[#allocation11 + $0x28] sm:$0xff] %v2311_v61  ;;  %v2313_v60 = vadd.f32 %v1755_v41, %v1309_v31 }
 0x3e7   :  { %1784 = vst [vmem:[#allocation11 + $0x30] sm:$0xff] %v2312_v59 }
 0x3e8   :  { %1785 = vst [vmem:[#allocation11 + $0x38] sm:$0xff] %v2313_v60 }
 0x3ea   :  { %v1759_v37 = vpop.f32.mrb[24].mxu0 }
 0x3eb   :  { %v2314_v39 = vadd.f32 %v1759_v37, %v1305_v1  ;;  %v1761_v33 = vpop.f32.mrb[25].mxu0 }
 0x3ec   :  { %v2315_v4 = vadd.f32 %v1761_v33, %v1309_v31  ;;  %v1763_v63 = vpop.f32.mrb[26].mxu0 }
 0x3ed   :  { %1786 = vst [vmem:[#allocation11 + $0x40] sm:$0xff] %v2314_v39  ;;  %v2316_v53 = vadd.f32 %v1763_v63, %v1305_v1  ;;  %v1765_v30 = vpop.f32.mrb[27].mxu0 }
 0x3ee   :  { %1787 = vst [vmem:[#allocation11 + $0x48] sm:$0xff] %v2315_v4  ;;  %v2317_v18 = vadd.f32 %v1765_v30, %v1309_v31 }
 0x3ef   :  { %1788 = vst [vmem:[#allocation11 + $0x50] sm:$0xff] %v2316_v53 }
 0x3f0   :  { %1789 = vst [vmem:[#allocation11 + $0x58] sm:$0xff] %v2317_v18 }
 0x3f2   :  { %v1769_v48 = vpop.f32.mrb[28].mxu0 }
 0x3f3   :  { %v2318_v47 = vadd.f32 %v1769_v48, %v1305_v1  ;;  %v1771_v46 = vpop.f32.mrb[29].mxu0 }
 0x3f4   :  { %v2319_v35 = vadd.f32 %v1771_v46, %v1309_v31  ;;  %v1773_v21 = vpop.f32.mrb[30].mxu0 }
 0x3f5   :  { %1790 = vst [vmem:[#allocation11 + $0x60] sm:$0xff] %v2318_v47  ;;  %v2320_v29 = vadd.f32 %v1773_v21, %v1305_v1  ;;  %v1775_v13 = vpop.f32.mrb[31].mxu0 }
 0x3f6   :  { %1791 = vst [vmem:[#allocation11 + $0x68] sm:$0xff] %v2319_v35  ;;  %v2321_v15 = vadd.f32 %v1775_v13, %v1309_v31 }
 0x3f7   :  { %1792 = vst [vmem:[#allocation11 + $0x70] sm:$0xff] %v2320_v29 }
 0x3f8   :  { %1793 = vst [vmem:[#allocation11 + $0x78] sm:$0xff] %v2321_v15 }
 0x3f9   :  { %2940 = shalt.err (!%p2937_p10)
}
 0x3fa   :  { %s2941_s12 = scalar_lea.hbm %s3767_s10, 2048 }
 0x3fb   :  { %p2942_p11 = scmp.ne.s32.totalorder %s3767_s10, %s2941_s12  ;;  %p2945_p12 = scmp.lt.u32.totalorder %s2941_s12, %s3767_s10 }
 0x3fd   :  { %p2947_p13 = pnand %p2945_p12, %p2942_p11 }
 0x3ff   :  { %2950 = shalt.err (!%p2947_p13)
}
 0x400   :  { %2122 = dma.vmem_to_hbm [thread:$0]  %s2117_s11, 2048, %s3767_s10, [#allocation4], %s2963_s29, %s2963_s29, %s2964_s30  }
 0x401   :  { %2957 = dma.done.wait [#allocation4], 2048  }
 0x402   :  { %2958 = vsyncadd [#allocation4], 4294965248 }
 0x403   :  { %2959 = dma.done.wait [#allocation13], 2048  }
 0x404   :  { %2960 = vsyncadd [#allocation13], 4294965248 }
 0x405   :  { %2141 = vsyncpa [#allocation3], 1 }
 0x406   :  { %2142 = vsyncpa [#allocation6], 1 }
 0x407   :  { %2143 = vsyncpa [#allocation9], 1 }
 0x408   :  { %2144 = vsyncpa [#allocation4], 1 }
 0x409   :  { %2145 = vsyncpa [#allocation13], 1 }

</bundles_post_ra>
